<compile_context>
chip_gen: v5e
topology: v5e:2x2
jax: 0.10.0
libtpu: 0.0.40
codegen_flags: <defaults>
</compile_context>

<pallas_src>
import functools

import jax
import jax.numpy as jnp
from jax import lax
from jax.experimental import pallas as pl
from jax.experimental.pallas import tpu as pltpu


def _round_up(x, m):
    return ((x + m - 1) // m) * m


def _conv_in_kernel(x_ref, w_ref, mask_ref, gamma_ref, beta_ref, o_ref, col_ref, *,
                    B_step, KH, KW, Wp, Lout_p, Cin_p, n_valid, eps):
    """B_step images per step: im2col conv (one MXU dot) + masked instance norm.

    x_ref:     (B_step, Cin_p, Lpad)        bf16  flattened reflect-padded images
    w_ref:     (Cout, KH*KW*Cin_p)          bf16  rows ordered (kh, kw, cin)
    mask_ref:  (1, Lout_p)                  f32   1.0 on valid output columns
    gamma_ref: (Cout, 1)                    f32
    beta_ref:  (Cout, 1)                    f32
    o_ref:     (B_step, Cout, Lout_p)       f32   "wide" outputs (Hout x Wp + lane pad)
    col_ref:   (KH*KW*Cin_p, B_step*Lout_p) bf16  im2col operand scratch
    """
    # Stage the im2col operand in bf16: tap (kh, kw) is a flat lane shift of the
    # padded image.  Every write is a full-sublane (Cin_p rows), lane-dense store,
    # and every staged lane comes from zero-padded finite data.
    for b in range(B_step):
        xb = x_ref[b]                                         # (Cin_p, Lpad), one load
        for kh in range(KH):
            for kw in range(KW):
                t = kh * KW + kw
                off = kh * Wp + kw                            # static lane offset
                col_ref[pl.ds(t * Cin_p, Cin_p), pl.ds(b * Lout_p, Lout_p)] = (
                    xb[:, off:off + Lout_p])

    # One contraction on the MXU: (Cout, K) @ (K, B_step*Lout_p), f32 accumulation.
    acc = jnp.dot(w_ref[...], col_ref[...], preferred_element_type=jnp.float32)

    # InstanceNorm2d (biased variance, affine): per-image masked stats over the valid
    # lanes of each Lout_p-wide segment.  Segment slices are static and 128-aligned.
    mask = mask_ref[...]                                      # (1, Lout_p)
    gamma = gamma_ref[...]                                    # (Cout, 1)
    beta = beta_ref[...]
    inv_n = 1.0 / n_valid
    for b in range(B_step):
        seg = acc[:, b * Lout_p:(b + 1) * Lout_p]             # (Cout, Lout_p)
        mean = jnp.sum(seg * mask, axis=1, keepdims=True) * inv_n
        centered = seg - mean
        var = jnp.sum(centered * centered * mask, axis=1, keepdims=True) * inv_n
        scale = lax.rsqrt(var + eps) * gamma                  # fold gamma into scale
        o_ref[b] = (centered * scale + beta).astype(o_ref.dtype)


def _device_kind():
    try:
        return jax.devices()[0].device_kind.lower()
    except Exception:
        return ""


def _batch_fold(N, k_rows, lout_p):
    """Images folded per grid step: fold on single-TC chips, keep >=2 steps on v7x."""
    min_steps = 2 if ("v7" in _device_kind() and N >= 2) else 1
    fold = max(1, N // min_steps)
    # Keep the bf16 col scratch under ~8 MiB regardless of batch size.
    max_lanes = max(lout_p, (8 * 1024 * 1024) // (k_rows * 2))
    fold = min(fold, max(1, max_lanes // lout_p))
    while N % fold:                                           # largest divisor of N
        fold -= 1
    return fold


def _vmem_limit_bytes():
    if "v7" in _device_kind():
        return 32 * 1024 * 1024       # v7x: 64 MiB physical, scoped default 32 MiB
    return 64 * 1024 * 1024           # v5e/v6e: 128 MiB physical VMEM


def conv_layer_forward(x_nchw, weight, bias, gamma, beta, *, stride=1, eps=1e-5):
    """ConvLayer forward: reflect-padded conv2d + InstanceNorm2d(affine=True).

    x_nchw: (N, Cin, H, W); weight: (Cout, Cin, KH, KW) [PyTorch OIHW];
    bias/gamma/beta: (Cout,).  Returns (N, Cout, Hout, Wout) float32.
    """
    del bias  # InstanceNorm's per-channel mean subtraction exactly cancels the conv bias.
    N, Cin, H, W = x_nchw.shape
    Cout, Cin_w, KH, KW = weight.shape
    assert Cin == Cin_w
    # TODO(synk): stride>1, groups>1 and the 'batch'/'None' norm branches of ConvLayer
    # are not implemented (tested config: stride=1, groups=1, norm_type='instance');
    # the conv bias must be reinstated for those branches.
    assert stride == 1

    pad_h, pad_w = KH // 2, KW // 2
    x_pad = jnp.pad(x_nchw, ((0, 0), (0, 0), (pad_h, pad_h), (pad_w, pad_w)),
                    mode="reflect")
    Hp, Wp = H + 2 * pad_h, W + 2 * pad_w
    Hout, Wout = Hp - KH + 1, Wp - KW + 1

    # "Wide" im2col geometry: compute Wp output columns per row; lane-pad to 128.
    Lout = Hout * Wp                           # real wide columns per channel
    Lout_p = _round_up(Lout, 128)              # lane-dense (unmasked vst) width
    n_valid = Hout * Wout                      # true H*W for instance-norm stats
    Cin_p = _round_up(Cin, 16)                 # bf16 sublane packing
    k_rows = KH * KW * Cin_p
    # The last tap reads lanes up to off_max + Lout_p; zero-pad the flat image there.
    Lpad = _round_up((KH - 1) * Wp + (KW - 1) + Lout_p, 128)

    # Flatten + zero-pad channels/lanes; DMA the image in bf16 (halves HBM bytes).
    x_flat = x_pad.reshape(N, Cin, Hp * Wp).astype(jnp.bfloat16)
    x_flat = jnp.pad(x_flat, ((0, 0), (0, Cin_p - Cin), (0, Lpad - Hp * Wp)))

    # Weight rows ordered (kh, kw, cin_p), zero rows matching the channel padding.
    w_t = jnp.transpose(weight, (0, 2, 3, 1))                 # (Cout, KH, KW, Cin)
    w_t = jnp.pad(w_t, ((0, 0), (0, 0), (0, 0), (0, Cin_p - Cin)))
    w_flat = w_t.reshape(Cout, k_rows).astype(jnp.bfloat16)

    # Valid-column mask: wide lane m is a real output iff m < Lout and (m % Wp) < Wout.
    m_idx = jnp.arange(Lout_p, dtype=jnp.int32)
    mask = ((m_idx < Lout) & (m_idx % Wp < Wout)).astype(jnp.float32).reshape(1, Lout_p)

    g2 = gamma.reshape(Cout, 1).astype(jnp.float32)
    be2 = beta.reshape(Cout, 1).astype(jnp.float32)

    B_step = _batch_fold(N, k_rows, Lout_p)

    kernel = functools.partial(
        _conv_in_kernel,
        B_step=B_step, KH=KH, KW=KW, Wp=Wp, Lout_p=Lout_p, Cin_p=Cin_p,
        n_valid=n_valid, eps=eps)

    out_wide = pl.pallas_call(
        kernel,
        out_shape=jax.ShapeDtypeStruct((N, Cout, Lout_p), jnp.float32),
        grid=(N // B_step,),
        in_specs=[
            pl.BlockSpec((B_step, Cin_p, Lpad), lambda n: (n, 0, 0)),
            # Constant index_maps: weight/mask/gamma/beta stay resident across steps.
            pl.BlockSpec((Cout, k_rows), lambda n: (0, 0)),
            pl.BlockSpec((1, Lout_p), lambda n: (0, 0)),
            pl.BlockSpec((Cout, 1), lambda n: (0, 0)),
            pl.BlockSpec((Cout, 1), lambda n: (0, 0)),
        ],
        out_specs=pl.BlockSpec((B_step, Cout, Lout_p), lambda n: (n, 0, 0)),
        scratch_shapes=[pltpu.VMEM((k_rows, B_step * Lout_p), jnp.bfloat16)],
        compiler_params=pltpu.CompilerParams(
            # Batch axis is independent -> shards across the 2 TCs on v7x.
            dimension_semantics=("parallel",),
            vmem_limit_bytes=_vmem_limit_bytes(),
        ),
        # TODO(synk): at production image sizes, row-band tile this: grid=(N, bands)
        # with dimension_semantics=("parallel","arbitrary"), each band = a slab of
        # output rows + a KH-1 halo, per-band col scratch, and streamed one-pass
        # per-channel sum/sum-sq finalized via pl.when on the last band, keeping
        # 2*(input band bf16 + col band bf16 + out band f32) <= ~24 MiB for v7x VMEM.
    )(x_flat, w_flat, mask, g2, be2)

    # Drop lane padding + wide-trick junk columns; the reshape is free (row-major).
    # TODO(synk): at production widths, fuse the reflect-pad and this crop into the
    # kernel (memory_space=pl.ANY + manual halo handling) to avoid the extra HBM
    # round trips; negligible at the 16x16 test shape.
    return out_wide[:, :, :Lout].reshape(N, Cout, Hout, Wp)[:, :, :, :Wout]


def _reference(x_nchw, weight, bias, gamma, beta, *, stride=1, eps=1e-5):
    """Pure-JAX f32 reference for validation."""
    KH, KW = weight.shape[2], weight.shape[3]
    x_pad = jnp.pad(x_nchw, ((0, 0), (0, 0), (KH // 2, KH // 2), (KW // 2, KW // 2)),
                    mode="reflect")
    y = lax.conv_general_dilated(
        x_pad, weight, window_strides=(stride, stride), padding="VALID",
        dimension_numbers=("NCHW", "OIHW", "NCHW"),
    ) + bias[None, :, None, None]
    mean = jnp.mean(y, axis=(2, 3), keepdims=True)
    var = jnp.mean((y - mean) ** 2, axis=(2, 3), keepdims=True)
    yn = (y - mean) * lax.rsqrt(var + eps)
    return yn * gamma[None, :, None, None] + beta[None, :, None, None]


if __name__ == "__main__":
    # ConvLayer(in_channels=4, out_channels=8, kernel_size=3, stride=1, norm_type='instance')
    N, Cin, H, W = 2, 4, 16, 16
    Cout, K, stride = 8, 3, 1

    key = jax.random.PRNGKey(0)
    kx, kw_, kb = jax.random.split(key, 3)
    x = jax.random.normal(kx, (N, Cin, H, W), dtype=jnp.float32)
    weight = jax.random.normal(kw_, (Cout, Cin, K, K), dtype=jnp.float32) * 0.1
    bias = jax.random.normal(kb, (Cout,), dtype=jnp.float32) * 0.1
    gamma = jnp.ones((Cout,), jnp.float32)   # InstanceNorm2d(affine=True) init
    beta = jnp.zeros((Cout,), jnp.float32)

    out = conv_layer_forward(x, weight, bias, gamma, beta, stride=stride)
    out = jax.block_until_ready(out)

    ref = _reference(x, weight, bias, gamma, beta, stride=stride)
    assert out.shape == (N, Cout, H // stride, W // stride), out.shape
    # bf16 MXU operands (f32 accumulation) -> slightly looser tolerance than pure f32.
    err = float(jnp.max(jnp.abs(out - ref)))
    assert jnp.allclose(out, ref, atol=3e-2, rtol=3e-2), f"mismatch vs reference: {err}"

    print("KERNEL_OK")
</pallas_src>

<mosaic_0001>
module attributes {stable_mosaic.version = 11 : i64} {
  func.func @_conv_in_kernel(%arg0: i32, %arg1: memref<2x16x512xbf16, #tpu.memory_space<vmem>>, %arg2: memref<8x144xbf16, #tpu.memory_space<vmem>>, %arg3: memref<1x384xf32, #tpu.memory_space<vmem>>, %arg4: memref<8x1xf32, #tpu.memory_space<vmem>>, %arg5: memref<8x1xf32, #tpu.memory_space<vmem>>, %arg6: memref<2x8x384xf32, #tpu.memory_space<vmem>>, %arg7: memref<144x768xbf16, #tpu.memory_space<vmem>>) attributes {dimension_semantics = [#tpu.dimension_semantics<parallel>], iteration_bounds = array<i64: 1>, scalar_prefetch = 0 : i64, scratch_operands = 1 : i64, tpu.core_type = #tpu.core_type<tc>, window_params = [{transform_indices = @transform_0, window_bounds = array<i64: 2, 16, 512>}, {pipeline_mode = #tpu.pipeline_mode<synchronous>, transform_indices = @transform_1, window_bounds = array<i64: 8, 144>}, {pipeline_mode = #tpu.pipeline_mode<synchronous>, transform_indices = @transform_2, window_bounds = array<i64: 1, 384>}, {pipeline_mode = #tpu.pipeline_mode<synchronous>, transform_indices = @transform_3, window_bounds = array<i64: 8, 1>}, {pipeline_mode = #tpu.pipeline_mode<synchronous>, transform_indices = @transform_4, window_bounds = array<i64: 8, 1>}, {transform_indices = @transform_5, window_bounds = array<i64: 2, 8, 384>}]} {
    %c0 = arith.constant 0 : index
    %c0_0 = arith.constant 0 : index
    %c0_1 = arith.constant 0 : index
    %0 = vector.load %arg1[%c0, %c0_0, %c0_1] : memref<2x16x512xbf16, #tpu.memory_space<vmem>>, vector<1x16x512xbf16>
    %1 = vector.shape_cast %0 : vector<1x16x512xbf16> to vector<16x512xbf16>
    %2 = vector.extract_strided_slice %1 {offsets = [0, 0], sizes = [16, 384], strides = [1, 1]} : vector<16x512xbf16> to vector<16x384xbf16>
    %c0_2 = arith.constant 0 : index
    %c0_3 = arith.constant 0 : index
    %3 = vector.load %arg7[%c0_2, %c0_3] : memref<144x768xbf16, #tpu.memory_space<vmem>>, vector<16x384xbf16>
    tpu.vector_store %arg7[%c0_2, %c0_3], %2 {strides = array<i32>} : memref<144x768xbf16, #tpu.memory_space<vmem>>, vector<16x384xbf16>,
    %4 = vector.extract_strided_slice %1 {offsets = [0, 1], sizes = [16, 384], strides = [1, 1]} : vector<16x512xbf16> to vector<16x384xbf16>
    %c16 = arith.constant 16 : index
    %c0_4 = arith.constant 0 : index
    %5 = vector.load %arg7[%c16, %c0_4] : memref<144x768xbf16, #tpu.memory_space<vmem>>, vector<16x384xbf16>
    tpu.vector_store %arg7[%c16, %c0_4], %4 {strides = array<i32>} : memref<144x768xbf16, #tpu.memory_space<vmem>>, vector<16x384xbf16>,
    %6 = vector.extract_strided_slice %1 {offsets = [0, 2], sizes = [16, 384], strides = [1, 1]} : vector<16x512xbf16> to vector<16x384xbf16>
    %c32 = arith.constant 32 : index
    %c0_5 = arith.constant 0 : index
    %7 = vector.load %arg7[%c32, %c0_5] : memref<144x768xbf16, #tpu.memory_space<vmem>>, vector<16x384xbf16>
    tpu.vector_store %arg7[%c32, %c0_5], %6 {strides = array<i32>} : memref<144x768xbf16, #tpu.memory_space<vmem>>, vector<16x384xbf16>,
    %8 = vector.extract_strided_slice %1 {offsets = [0, 18], sizes = [16, 384], strides = [1, 1]} : vector<16x512xbf16> to vector<16x384xbf16>
    %c48 = arith.constant 48 : index
    %c0_6 = arith.constant 0 : index
    %9 = vector.load %arg7[%c48, %c0_6] : memref<144x768xbf16, #tpu.memory_space<vmem>>, vector<16x384xbf16>
    tpu.vector_store %arg7[%c48, %c0_6], %8 {strides = array<i32>} : memref<144x768xbf16, #tpu.memory_space<vmem>>, vector<16x384xbf16>,
    %10 = vector.extract_strided_slice %1 {offsets = [0, 19], sizes = [16, 384], strides = [1, 1]} : vector<16x512xbf16> to vector<16x384xbf16>
    %c64 = arith.constant 64 : index
    %c0_7 = arith.constant 0 : index
    %11 = vector.load %arg7[%c64, %c0_7] : memref<144x768xbf16, #tpu.memory_space<vmem>>, vector<16x384xbf16>
    tpu.vector_store %arg7[%c64, %c0_7], %10 {strides = array<i32>} : memref<144x768xbf16, #tpu.memory_space<vmem>>, vector<16x384xbf16>,
    %12 = vector.extract_strided_slice %1 {offsets = [0, 20], sizes = [16, 384], strides = [1, 1]} : vector<16x512xbf16> to vector<16x384xbf16>
    %c80 = arith.constant 80 : index
    %c0_8 = arith.constant 0 : index
    %13 = vector.load %arg7[%c80, %c0_8] : memref<144x768xbf16, #tpu.memory_space<vmem>>, vector<16x384xbf16>
    tpu.vector_store %arg7[%c80, %c0_8], %12 {strides = array<i32>} : memref<144x768xbf16, #tpu.memory_space<vmem>>, vector<16x384xbf16>,
    %14 = vector.extract_strided_slice %1 {offsets = [0, 36], sizes = [16, 384], strides = [1, 1]} : vector<16x512xbf16> to vector<16x384xbf16>
    %c96 = arith.constant 96 : index
    %c0_9 = arith.constant 0 : index
    %15 = vector.load %arg7[%c96, %c0_9] : memref<144x768xbf16, #tpu.memory_space<vmem>>, vector<16x384xbf16>
    tpu.vector_store %arg7[%c96, %c0_9], %14 {strides = array<i32>} : memref<144x768xbf16, #tpu.memory_space<vmem>>, vector<16x384xbf16>,
    %16 = vector.extract_strided_slice %1 {offsets = [0, 37], sizes = [16, 384], strides = [1, 1]} : vector<16x512xbf16> to vector<16x384xbf16>
    %c112 = arith.constant 112 : index
    %c0_10 = arith.constant 0 : index
    %17 = vector.load %arg7[%c112, %c0_10] : memref<144x768xbf16, #tpu.memory_space<vmem>>, vector<16x384xbf16>
    tpu.vector_store %arg7[%c112, %c0_10], %16 {strides = array<i32>} : memref<144x768xbf16, #tpu.memory_space<vmem>>, vector<16x384xbf16>,
    %18 = vector.extract_strided_slice %1 {offsets = [0, 38], sizes = [16, 384], strides = [1, 1]} : vector<16x512xbf16> to vector<16x384xbf16>
    %c128 = arith.constant 128 : index
    %c0_11 = arith.constant 0 : index
    %19 = vector.load %arg7[%c128, %c0_11] : memref<144x768xbf16, #tpu.memory_space<vmem>>, vector<16x384xbf16>
    tpu.vector_store %arg7[%c128, %c0_11], %18 {strides = array<i32>} : memref<144x768xbf16, #tpu.memory_space<vmem>>, vector<16x384xbf16>,
    %c1 = arith.constant 1 : index
    %c0_12 = arith.constant 0 : index
    %c0_13 = arith.constant 0 : index
    %20 = vector.load %arg1[%c1, %c0_12, %c0_13] : memref<2x16x512xbf16, #tpu.memory_space<vmem>>, vector<1x16x512xbf16>
    %21 = vector.shape_cast %20 : vector<1x16x512xbf16> to vector<16x512xbf16>
    %22 = vector.extract_strided_slice %21 {offsets = [0, 0], sizes = [16, 384], strides = [1, 1]} : vector<16x512xbf16> to vector<16x384xbf16>
    %c0_14 = arith.constant 0 : index
    %c384 = arith.constant 384 : index
    %23 = vector.load %arg7[%c0_14, %c384] : memref<144x768xbf16, #tpu.memory_space<vmem>>, vector<16x384xbf16>
    tpu.vector_store %arg7[%c0_14, %c384], %22 {strides = array<i32>} : memref<144x768xbf16, #tpu.memory_space<vmem>>, vector<16x384xbf16>,
    %24 = vector.extract_strided_slice %21 {offsets = [0, 1], sizes = [16, 384], strides = [1, 1]} : vector<16x512xbf16> to vector<16x384xbf16>
    %c16_15 = arith.constant 16 : index
    %c384_16 = arith.constant 384 : index
    %25 = vector.load %arg7[%c16_15, %c384_16] : memref<144x768xbf16, #tpu.memory_space<vmem>>, vector<16x384xbf16>
    tpu.vector_store %arg7[%c16_15, %c384_16], %24 {strides = array<i32>} : memref<144x768xbf16, #tpu.memory_space<vmem>>, vector<16x384xbf16>,
    %26 = vector.extract_strided_slice %21 {offsets = [0, 2], sizes = [16, 384], strides = [1, 1]} : vector<16x512xbf16> to vector<16x384xbf16>
    %c32_17 = arith.constant 32 : index
    %c384_18 = arith.constant 384 : index
    %27 = vector.load %arg7[%c32_17, %c384_18] : memref<144x768xbf16, #tpu.memory_space<vmem>>, vector<16x384xbf16>
    tpu.vector_store %arg7[%c32_17, %c384_18], %26 {strides = array<i32>} : memref<144x768xbf16, #tpu.memory_space<vmem>>, vector<16x384xbf16>,
    %28 = vector.extract_strided_slice %21 {offsets = [0, 18], sizes = [16, 384], strides = [1, 1]} : vector<16x512xbf16> to vector<16x384xbf16>
    %c48_19 = arith.constant 48 : index
    %c384_20 = arith.constant 384 : index
    %29 = vector.load %arg7[%c48_19, %c384_20] : memref<144x768xbf16, #tpu.memory_space<vmem>>, vector<16x384xbf16>
    tpu.vector_store %arg7[%c48_19, %c384_20], %28 {strides = array<i32>} : memref<144x768xbf16, #tpu.memory_space<vmem>>, vector<16x384xbf16>,
    %30 = vector.extract_strided_slice %21 {offsets = [0, 19], sizes = [16, 384], strides = [1, 1]} : vector<16x512xbf16> to vector<16x384xbf16>
    %c64_21 = arith.constant 64 : index
    %c384_22 = arith.constant 384 : index
    %31 = vector.load %arg7[%c64_21, %c384_22] : memref<144x768xbf16, #tpu.memory_space<vmem>>, vector<16x384xbf16>
    tpu.vector_store %arg7[%c64_21, %c384_22], %30 {strides = array<i32>} : memref<144x768xbf16, #tpu.memory_space<vmem>>, vector<16x384xbf16>,
    %32 = vector.extract_strided_slice %21 {offsets = [0, 20], sizes = [16, 384], strides = [1, 1]} : vector<16x512xbf16> to vector<16x384xbf16>
    %c80_23 = arith.constant 80 : index
    %c384_24 = arith.constant 384 : index
    %33 = vector.load %arg7[%c80_23, %c384_24] : memref<144x768xbf16, #tpu.memory_space<vmem>>, vector<16x384xbf16>
    tpu.vector_store %arg7[%c80_23, %c384_24], %32 {strides = array<i32>} : memref<144x768xbf16, #tpu.memory_space<vmem>>, vector<16x384xbf16>,
    %34 = vector.extract_strided_slice %21 {offsets = [0, 36], sizes = [16, 384], strides = [1, 1]} : vector<16x512xbf16> to vector<16x384xbf16>
    %c96_25 = arith.constant 96 : index
    %c384_26 = arith.constant 384 : index
    %35 = vector.load %arg7[%c96_25, %c384_26] : memref<144x768xbf16, #tpu.memory_space<vmem>>, vector<16x384xbf16>
    tpu.vector_store %arg7[%c96_25, %c384_26], %34 {strides = array<i32>} : memref<144x768xbf16, #tpu.memory_space<vmem>>, vector<16x384xbf16>,
    %36 = vector.extract_strided_slice %21 {offsets = [0, 37], sizes = [16, 384], strides = [1, 1]} : vector<16x512xbf16> to vector<16x384xbf16>
    %c112_27 = arith.constant 112 : index
    %c384_28 = arith.constant 384 : index
    %37 = vector.load %arg7[%c112_27, %c384_28] : memref<144x768xbf16, #tpu.memory_space<vmem>>, vector<16x384xbf16>
    tpu.vector_store %arg7[%c112_27, %c384_28], %36 {strides = array<i32>} : memref<144x768xbf16, #tpu.memory_space<vmem>>, vector<16x384xbf16>,
    %38 = vector.extract_strided_slice %21 {offsets = [0, 38], sizes = [16, 384], strides = [1, 1]} : vector<16x512xbf16> to vector<16x384xbf16>
    %c128_29 = arith.constant 128 : index
    %c384_30 = arith.constant 384 : index
    %39 = vector.load %arg7[%c128_29, %c384_30] : memref<144x768xbf16, #tpu.memory_space<vmem>>, vector<16x384xbf16>
    tpu.vector_store %arg7[%c128_29, %c384_30], %38 {strides = array<i32>} : memref<144x768xbf16, #tpu.memory_space<vmem>>, vector<16x384xbf16>,
    %c0_31 = arith.constant 0 : index
    %c0_32 = arith.constant 0 : index
    %40 = vector.load %arg2[%c0_31, %c0_32] : memref<8x144xbf16, #tpu.memory_space<vmem>>, vector<8x144xbf16>
    %c0_33 = arith.constant 0 : index
    %c0_34 = arith.constant 0 : index
    %41 = vector.load %arg7[%c0_33, %c0_34] : memref<144x768xbf16, #tpu.memory_space<vmem>>, vector<144x768xbf16>
    %cst = arith.constant dense<0.000000e+00> : vector<8x768xf32>
    %42 = tpu.matmul %40, %41, %cst {dimension_numbers = #tpu.dot_dimension_numbers<[1], [0], [0], [1], [0, 0, 1, 1], [], []>} : vector<8x144xbf16>, vector<144x768xbf16>, vector<8x768xf32> -> vector<8x768xf32>
    %c0_35 = arith.constant 0 : index
    %c0_36 = arith.constant 0 : index
    %43 = vector.load %arg3[%c0_35, %c0_36] : memref<1x384xf32, #tpu.memory_space<vmem>>, vector<1x384xf32>
    %c0_37 = arith.constant 0 : index
    %c0_38 = arith.constant 0 : index
    %44 = vector.load %arg4[%c0_37, %c0_38] : memref<8x1xf32, #tpu.memory_space<vmem>>, vector<8x1xf32>
    %c0_39 = arith.constant 0 : index
    %c0_40 = arith.constant 0 : index
    %45 = vector.load %arg5[%c0_39, %c0_40] : memref<8x1xf32, #tpu.memory_space<vmem>>, vector<8x1xf32>
    %46 = vector.extract_strided_slice %42 {offsets = [0, 0], sizes = [8, 384], strides = [1, 1]} : vector<8x768xf32> to vector<8x384xf32>
    %47 = vector.broadcast %43 : vector<1x384xf32> to vector<8x384xf32>
    %48 = arith.mulf %46, %47 : vector<8x384xf32>
    %cst_41 = arith.constant dense<0.000000e+00> : vector<8xf32>
    %49 = vector.multi_reduction <add>, %48, %cst_41 [1] : vector<8x384xf32> to vector<8xf32>
    %50 = vector.shape_cast %49 : vector<8xf32> to vector<8x1xf32>
    %cst_42 = arith.constant 3.906250e-03 : f32
    %51 = vector.broadcast %cst_42 : f32 to vector<8x1xf32>
    %52 = arith.mulf %50, %51 : vector<8x1xf32>
    %53 = vector.broadcast %52 : vector<8x1xf32> to vector<8x384xf32>
    %54 = arith.subf %46, %53 : vector<8x384xf32>
    %55 = arith.mulf %54, %54 : vector<8x384xf32>
    %56 = vector.broadcast %43 : vector<1x384xf32> to vector<8x384xf32>
    %57 = arith.mulf %55, %56 : vector<8x384xf32>
    %cst_43 = arith.constant dense<0.000000e+00> : vector<8xf32>
    %58 = vector.multi_reduction <add>, %57, %cst_43 [1] : vector<8x384xf32> to vector<8xf32>
    %59 = vector.shape_cast %58 : vector<8xf32> to vector<8x1xf32>
    %cst_44 = arith.constant 3.906250e-03 : f32
    %60 = vector.broadcast %cst_44 : f32 to vector<8x1xf32>
    %61 = arith.mulf %59, %60 : vector<8x1xf32>
    %cst_45 = arith.constant 9.99999974E-6 : f32
    %62 = vector.broadcast %cst_45 : f32 to vector<8x1xf32>
    %63 = arith.addf %61, %62 : vector<8x1xf32>
    %64 = math.rsqrt %63 : vector<8x1xf32>
    %65 = arith.mulf %64, %44 : vector<8x1xf32>
    %66 = vector.broadcast %65 : vector<8x1xf32> to vector<8x384xf32>
    %67 = arith.mulf %54, %66 : vector<8x384xf32>
    %68 = vector.broadcast %45 : vector<8x1xf32> to vector<8x384xf32>
    %69 = arith.addf %67, %68 : vector<8x384xf32>
    %c0_46 = arith.constant 0 : index
    %c0_47 = arith.constant 0 : index
    %c0_48 = arith.constant 0 : index
    %70 = vector.load %arg6[%c0_46, %c0_47, %c0_48] : memref<2x8x384xf32, #tpu.memory_space<vmem>>, vector<1x8x384xf32>
    %71 = vector.shape_cast %70 : vector<1x8x384xf32> to vector<8x384xf32>
    %72 = vector.shape_cast %69 : vector<8x384xf32> to vector<1x8x384xf32>
    tpu.vector_store %arg6[%c0_46, %c0_47, %c0_48], %72 {strides = array<i32>} : memref<2x8x384xf32, #tpu.memory_space<vmem>>, vector<1x8x384xf32>,
    %73 = vector.extract_strided_slice %42 {offsets = [0, 384], sizes = [8, 384], strides = [1, 1]} : vector<8x768xf32> to vector<8x384xf32>
    %74 = vector.broadcast %43 : vector<1x384xf32> to vector<8x384xf32>
    %75 = arith.mulf %73, %74 : vector<8x384xf32>
    %cst_49 = arith.constant dense<0.000000e+00> : vector<8xf32>
    %76 = vector.multi_reduction <add>, %75, %cst_49 [1] : vector<8x384xf32> to vector<8xf32>
    %77 = vector.shape_cast %76 : vector<8xf32> to vector<8x1xf32>
    %cst_50 = arith.constant 3.906250e-03 : f32
    %78 = vector.broadcast %cst_50 : f32 to vector<8x1xf32>
    %79 = arith.mulf %77, %78 : vector<8x1xf32>
    %80 = vector.broadcast %79 : vector<8x1xf32> to vector<8x384xf32>
    %81 = arith.subf %73, %80 : vector<8x384xf32>
    %82 = arith.mulf %81, %81 : vector<8x384xf32>
    %83 = vector.broadcast %43 : vector<1x384xf32> to vector<8x384xf32>
    %84 = arith.mulf %82, %83 : vector<8x384xf32>
    %cst_51 = arith.constant dense<0.000000e+00> : vector<8xf32>
    %85 = vector.multi_reduction <add>, %84, %cst_51 [1] : vector<8x384xf32> to vector<8xf32>
    %86 = vector.shape_cast %85 : vector<8xf32> to vector<8x1xf32>
    %cst_52 = arith.constant 3.906250e-03 : f32
    %87 = vector.broadcast %cst_52 : f32 to vector<8x1xf32>
    %88 = arith.mulf %86, %87 : vector<8x1xf32>
    %cst_53 = arith.constant 9.99999974E-6 : f32
    %89 = vector.broadcast %cst_53 : f32 to vector<8x1xf32>
    %90 = arith.addf %88, %89 : vector<8x1xf32>
    %91 = math.rsqrt %90 : vector<8x1xf32>
    %92 = arith.mulf %91, %44 : vector<8x1xf32>
    %93 = vector.broadcast %92 : vector<8x1xf32> to vector<8x384xf32>
    %94 = arith.mulf %81, %93 : vector<8x384xf32>
    %95 = vector.broadcast %45 : vector<8x1xf32> to vector<8x384xf32>
    %96 = arith.addf %94, %95 : vector<8x384xf32>
    %c1_54 = arith.constant 1 : index
    %c0_55 = arith.constant 0 : index
    %c0_56 = arith.constant 0 : index
    %97 = vector.load %arg6[%c1_54, %c0_55, %c0_56] : memref<2x8x384xf32, #tpu.memory_space<vmem>>, vector<1x8x384xf32>
    %98 = vector.shape_cast %97 : vector<1x8x384xf32> to vector<8x384xf32>
    %99 = vector.shape_cast %96 : vector<8x384xf32> to vector<1x8x384xf32>
    tpu.vector_store %arg6[%c1_54, %c0_55, %c0_56], %99 {strides = array<i32>} : memref<2x8x384xf32, #tpu.memory_space<vmem>>, vector<1x8x384xf32>,
    return
  }
  func.func @transform_0(%arg0: i32) -> (i32, i32, i32) {
    %c0_i32 = arith.constant 0 : i32
    %c0_i32_0 = arith.constant 0 : i32
    %c0_i32_1 = arith.constant 0 : i32
    return %arg0, %c0_i32, %c0_i32_0 : i32, i32, i32
  }
  func.func @transform_1(%arg0: i32) -> (i32, i32) {
    %c0_i32 = arith.constant 0 : i32
    %c0_i32_0 = arith.constant 0 : i32
    %c0_i32_1 = arith.constant 0 : i32
    return %c0_i32, %c0_i32_0 : i32, i32
  }
  func.func @transform_2(%arg0: i32) -> (i32, i32) {
    %c0_i32 = arith.constant 0 : i32
    %c0_i32_0 = arith.constant 0 : i32
    %c0_i32_1 = arith.constant 0 : i32
    return %c0_i32, %c0_i32_0 : i32, i32
  }
  func.func @transform_3(%arg0: i32) -> (i32, i32) {
    %c0_i32 = arith.constant 0 : i32
    %c0_i32_0 = arith.constant 0 : i32
    %c0_i32_1 = arith.constant 0 : i32
    return %c0_i32, %c0_i32_0 : i32, i32
  }
  func.func @transform_4(%arg0: i32) -> (i32, i32) {
    %c0_i32 = arith.constant 0 : i32
    %c0_i32_0 = arith.constant 0 : i32
    %c0_i32_1 = arith.constant 0 : i32
    return %c0_i32, %c0_i32_0 : i32, i32
  }
  func.func @transform_5(%arg0: i32) -> (i32, i32, i32) {
    %c0_i32 = arith.constant 0 : i32
    %c0_i32_0 = arith.constant 0 : i32
    %c0_i32_1 = arith.constant 0 : i32
    return %arg0, %c0_i32, %c0_i32_0 : i32, i32, i32
  }
}

</mosaic_0001>

<bundles_post_ra>
// kernel: tpu_custom_call.1
= control target key start
LH: loop header
LB: loop body
LE: loop exit
PB: predicated region body
PF: predicated region fallthrough
CT: control target
= control target key end

     0   :  { %10 = vsyncpa [#allocation4], 0  ;;  %s1898_s0 = inlined_call_operand.hbm [shape: bf16[2,16,512], index: 0, kind: input, shape index: {}]   ;;  %s1899_s1 = inlined_call_operand.vmem [shape: bf16[8,144], index: 1, kind: input, shape index: {}]   ;;  %s1900_s2 = inlined_call_operand.vmem [shape: f32[1,384], index: 2, kind: input, shape index: {}]   ;;  %s1901_s3 = inlined_call_operand.vmem [shape: f32[8,1], index: 3, kind: input, shape index: {}]   ;;  %s1902_s4 = inlined_call_operand.vmem [shape: f32[8,1], index: 4, kind: input, shape index: {}]   ;;  %s1903_s5 = inlined_call_operand.hbm [shape: f32[2,8,384], index: 5, kind: output, shape index: {}]  }
   0x1   :  { %11 = vsyncpa [#allocation5], 0  ;;  %s16_s20 = sshll.u32 %s1898_s0, 4  ;;  %s1460_s21 = smov [#allocation3]   ;;  %s17_s20 = int_to_ptr.hbm [resolvable:$true] %s16_s20 }
   0x2   :  { %s18_s22 = sshll.u32 %s1460_s21, 4  ;;  %s1461_s23 = smov 256   ;;  %s19_s22 = int_to_ptr.vmem [resolvable:$true] %s18_s22 }
   0x3   :  { %s1462_s24 = smov 16  }
   0x4   :  { %24 = dma.hbm_to_vmem [thread:$0]  %s17_s20, 1024, %s19_s22, [#allocation4], %s1461_s23, %s1461_s23, %s1462_s24  }
   0x5   :  { %1456 = dma.done.wait [#allocation4], 1024  }
   0x6   :  { %1457 = vsyncadd [#allocation4], 4294966272  ;;  %v1508_v0 = vld [vmem:[#allocation3 + $0x8] sm:$0xff]  ;;  %v1510_v1 = vld [vmem:[#allocation3] sm:$0xff]  ;;  %s1463_s25 = smov 91   ;;  %s1464_s0 = smov 90  }
   0x7   :  { %v1512_v2 = vld [vmem:[#allocation3 + $0x10] sm:$0xff]  ;;  %215 = vrot.lane.b32.xlu0 %v1508_v0, %s1463_s25  ;;  %43 = vst [vmem:[#allocation2 + $0x8] sm:$0xf] %v1508_v0  ;;  %240 = vrot.lane.b32.xlu1 %v1510_v1, %s1464_s0  ;;  %v1522_v3 = vld [vmem:[#allocation3 + $0x18] sm:$0xff]  ;;  %v1525_v4 = vld [vmem:[#allocation3 + $0x20] sm:$0xff]  ;;  %s1465_s26 = smov 92  }
   0x8   :  { %42 = vst [vmem:[#allocation2] sm:$0xff] %v1510_v1  ;;  %244 = vrot.lane.b32.xlu2 %v1512_v2, %s1464_s0  ;;  %v1528_v5 = vld [vmem:[#allocation3 + $0x30] sm:$0xff]  ;;  %v1531_v6 = vld [vmem:[#allocation3 + $0x28] sm:$0xff]  ;;  %v1534_v7 = vld [vmem:[#allocation3 + $0x38] sm:$0xff]  ;;  %s1466_s27 = smov 108   ;;  %s1467_s28 = smov 109  }
   0x9   :  { %44 = vst [vmem:[#allocation2 + $0x18] sm:$0xff] %v1512_v2  ;;  %s1468_s29 = smov 110   ;;  %s1469_s30 = smov 126   ;;  %vm253_vm0 = vcmask 736256   ;;  %vm62_vm1 = vcmask 1043456   ;;  %vm226_vm2 = vcmask 744448  }
   0xa   :  { %45 = vst [vmem:[#allocation2 + $0x20] sm:$0xf] %v1522_v3  ;;  %s1470_s6 = smov 127   ;;  %vm172_vm3 = vcmask 883712   ;;  %v1633_v38 = vld [vmem:[%s1899_s1] sm:$0xff]  ;;  %vm199_vm4 = vcmask 752640  }
   0xb   :  { %272 = vst [vmem:[#allocation2 + $0xc] sm:$0xff] %v1525_v4  ;;  %v545_v46 = vunpack.c.h.b16 %v1633_v38  ;;  %vm819_vm5 = vcmask 130048   ;;  %vm145_vm6 = vcmask 891904   ;;  %vm91_vm7 = vcmask 1031168   ;;  %s1097_s15 = sshll.u32 %s1903_s5, 4  ;;  %s1473_s16 = smov 384   ;;  %s1098_s15 = int_to_ptr.hbm [resolvable:$true] %s1097_s15 }
   0xc   :  { %274 = vst [vmem:[#allocation2 + $0x24] sm:$0xff] %v1528_v5  ;;  %vm118_vm8 = vcmask 900096   ;;  %vm64_vm9 = vcmask 1039360   ;;  %s1474_s17 = smov 24  }
   0xd   :  { %273 = vst [vmem:[#allocation2 + $0x14] sm:$0xf] %v1531_v6  ;;  %v1650_v62 = vpack.c.b16 %v545_v46, %v545_v46 }
   0xe   :  { %275 = vst [vmem:[#allocation2 + $0x2c] sm:$0xf] %v1534_v7 }
   0xf   :  { %219 = vrot.lane.b32.xlu0 %v1522_v3, %s1463_s25  ;;  %242 = vrot.lane.b32.xlu1 %v1508_v0, %s1464_s0 }
  0x10   :  { %246 = vrot.lane.b32.xlu2 %v1522_v3, %s1464_s0 }
  0x17   :  { %188 = vrot.lane.b32.xlu0 %v1508_v0, %s1465_s26  ;;  %192 = vrot.lane.b32.xlu1 %v1522_v3, %s1465_s26 }
  0x18   :  { %213 = vrot.lane.b32.xlu2 %v1510_v1, %s1463_s25 }
  0x1f   :  { %217 = vrot.lane.b32.xlu0 %v1512_v2, %s1463_s25  ;;  %436 = vrot.lane.b32.xlu1 %v1525_v4, %s1463_s25 }
  0x20   :  { %438 = vrot.lane.b32.xlu2 %v1531_v6, %s1463_s25 }
  0x27   :  { %440 = vrot.lane.b32.xlu0 %v1528_v5, %s1463_s25  ;;  %442 = vrot.lane.b32.xlu1 %v1534_v7, %s1463_s25 }
  0x28   :  { %161 = vrot.lane.b32.xlu2 %v1508_v0, %s1466_s27 }
  0x2f   :  { %165 = vrot.lane.b32.xlu0 %v1522_v3, %s1466_s27  ;;  %186 = vrot.lane.b32.xlu1 %v1510_v1, %s1465_s26 }
  0x30   :  { %190 = vrot.lane.b32.xlu2 %v1512_v2, %s1465_s26 }
  0x37   :  { %410 = vrot.lane.b32.xlu0 %v1525_v4, %s1465_s26  ;;  %412 = vrot.lane.b32.xlu1 %v1531_v6, %s1465_s26 }
  0x38   :  { %414 = vrot.lane.b32.xlu2 %v1528_v5, %s1465_s26 }
  0x3f   :  { %416 = vrot.lane.b32.xlu0 %v1534_v7, %s1465_s26  ;;  %134 = vrot.lane.b32.xlu1 %v1508_v0, %s1467_s28 }
  0x40   :  { %138 = vrot.lane.b32.xlu2 %v1522_v3, %s1467_s28 }
  0x47   :  { %159 = vrot.lane.b32.xlu0 %v1510_v1, %s1466_s27  ;;  %163 = vrot.lane.b32.xlu1 %v1512_v2, %s1466_s27 }
  0x48   :  { %384 = vrot.lane.b32.xlu2 %v1525_v4, %s1466_s27 }
  0x4f   :  { %386 = vrot.lane.b32.xlu0 %v1531_v6, %s1466_s27  ;;  %388 = vrot.lane.b32.xlu1 %v1528_v5, %s1466_s27 }
  0x50   :  { %390 = vrot.lane.b32.xlu2 %v1534_v7, %s1466_s27 }
  0x57   :  { %107 = vrot.lane.b32.xlu0 %v1508_v0, %s1468_s29  ;;  %111 = vrot.lane.b32.xlu1 %v1522_v3, %s1468_s29 }
  0x58   :  { %132 = vrot.lane.b32.xlu2 %v1510_v1, %s1467_s28 }
  0x5f   :  { %136 = vrot.lane.b32.xlu0 %v1512_v2, %s1467_s28  ;;  %358 = vrot.lane.b32.xlu1 %v1525_v4, %s1467_s28 }
  0x60   :  { %360 = vrot.lane.b32.xlu2 %v1531_v6, %s1467_s28 }
  0x62   :  { %v245_v8 = vpop.permute.xlu2 %244 }
  0x63   :  { %v250_v9 = vrot.slane %v245_v8, 4 }
  0x67   :  { %362 = vrot.lane.b32.xlu0 %v1528_v5, %s1467_s28  ;;  %364 = vrot.lane.b32.xlu1 %v1534_v7, %s1467_s28 }
  0x68   :  { %80 = vrot.lane.b32.xlu2 %v1508_v0, %s1469_s30 }
  0x6a   :  { %v247_v10 = vpop.permute.xlu2 %246 }
  0x6b   :  { %v251_v11 = vrot.slane %v247_v10, 4 }
  0x6d   :  { %v256_v12 = vsel %vm62_vm1, %v250_v9, %v251_v11  ;;  %v258_v13 = vsel %vm253_vm0, %v247_v10, %v251_v11 }
  0x6e   :  { %v257_v14 = vsel %vm253_vm0, %v245_v8, %v256_v12  ;;  %266 = vst [vmem:[#allocation2 + $0x1a0] sm:$0xf] %v258_v13 }
  0x6f   :  { %84 = vrot.lane.b32.xlu0 %v1522_v3, %s1469_s30  ;;  %105 = vrot.lane.b32.xlu1 %v1510_v1, %s1468_s29  ;;  %265 = vst [vmem:[#allocation2 + $0x198] sm:$0xff] %v257_v14 }
  0x70   :  { %109 = vrot.lane.b32.xlu2 %v1512_v2, %s1468_s29 }
  0x72   :  { %v214_v15 = vpop.permute.xlu2 %213 }
  0x73   :  { %v221_v16 = vrot.slane %v214_v15, 4 }
  0x75   :  { %v1384_v45 = vld [vmem:[#allocation2 + $0x19c] sm:$0xf0] }
  0x76   :  { %v1383_v49 = vld [vmem:[#allocation2 + $0x194] sm:$0xf0]  ;;  %v1306_v50 = vld [vmem:[#allocation2 + $0x198] sm:$0xf0] }
  0x77   :  { %332 = vrot.lane.b32.xlu0 %v1525_v4, %s1468_s29  ;;  %334 = vrot.lane.b32.xlu1 %v1531_v6, %s1468_s29 }
  0x78   :  { %336 = vrot.lane.b32.xlu2 %v1528_v5, %s1468_s29 }
  0x79   :  { %v216_v17 = vpop.permute.xlu0 %215  ;;  %v241_v18 = vpop.permute.xlu1 %240 }
  0x7a   :  { %v222_v19 = vrot.slane %v216_v17, 4  ;;  %v1593_v20 = vpop.permute.xlu2 %438  ;;  %v248_v28 = vrot.slane %v241_v18, 4 }
  0x7b   :  { %v445_v21 = vrot.slane %v1593_v20, 4 }
  0x7c   :  { %v228_v22 = vsel %vm226_vm2, %v216_v17, %v222_v19  ;;  %v225_v23 = vsel %vm62_vm1, %v221_v16, %v222_v19 }
  0x7d   :  { %237 = vst [vmem:[#allocation2 + $0x158] sm:$0xf] %v228_v22  ;;  %v227_v24 = vsel %vm226_vm2, %v214_v15, %v225_v23  ;;  %v450_v25 = vsel %vm226_vm2, %v1593_v20, %v445_v21 }
  0x7e   :  { %236 = vst [vmem:[#allocation2 + $0x150] sm:$0xff] %v227_v24 }
  0x7f   :  { %338 = vrot.lane.b32.xlu0 %v1534_v7, %s1468_s29  ;;  %52 = vrot.lane.b32.xlu1 %v1508_v0, %s1470_s6  ;;  %459 = vst [vmem:[#allocation2 + $0x164] sm:$0xf] %v450_v25 }
  0x80   :  { %56 = vrot.lane.b32.xlu2 %v1522_v3, %s1470_s6 }
  0x81   :  { %v1609_v26 = vpop.permute.xlu0 %219  ;;  %v243_v27 = vpop.permute.xlu1 %242 }
  0x82   :  { %v224_v29 = vrot.slane %v1609_v26, 4  ;;  %v249_v30 = vrot.slane %v243_v27, 4  ;;  %v1612_v31 = vpop.permute.xlu2 %161 }
  0x83   :  { %v168_v32 = vrot.slane %v1612_v31, 4 }
  0x84   :  { %v231_v33 = vsel %vm226_vm2, %v1609_v26, %v224_v29  ;;  %v252_v34 = vsel %vm62_vm1, %v248_v28, %v249_v30  ;;  %v255_v35 = vsel %vm253_vm0, %v243_v27, %v249_v30  ;;  %v1288_v58 = vld [vmem:[#allocation2 + $0x158] sm:$0xf] }
  0x85   :  { %239 = vst [vmem:[#allocation2 + $0x170] sm:$0xf] %v231_v33  ;;  %v254_v36 = vsel %vm253_vm0, %v241_v18, %v252_v34  ;;  %v174_v37 = vsel %vm172_vm3, %v1612_v31, %v168_v32  ;;  %v1280_v24 = vld [vmem:[#allocation2 + $0x150] sm:$0xf]  ;;  %v1374_v25 = vld [vmem:[#allocation2 + $0x154] sm:$0xf] }
  0x86   :  { %263 = vst [vmem:[#allocation2 + $0x180] sm:$0xff] %v254_v36 }
  0x87   :  { %264 = vst [vmem:[#allocation2 + $0x188] sm:$0xf] %v255_v35  ;;  %78 = vrot.lane.b32.xlu0 %v1510_v1, %s1469_s30  ;;  %82 = vrot.lane.b32.xlu1 %v1512_v2, %s1469_s30 }
  0x88   :  { %183 = vst [vmem:[#allocation2 + $0xf8] sm:$0xf] %v174_v37  ;;  %306 = vrot.lane.b32.xlu2 %v1525_v4, %s1469_s30 }
  0x89   :  { %v1635_v39 = vpop.permute.xlu0 %188  ;;  %v193_v40 = vpop.permute.xlu1 %192 }
  0x8a   :  { %v195_v41 = vrot.slane %v1635_v39, 4  ;;  %v197_v42 = vrot.slane %v193_v40, 4  ;;  %v191_v43 = vpop.permute.xlu2 %190 }
  0x8b   :  { %v196_v44 = vrot.slane %v191_v43, 4 }
  0x8c   :  { %v201_v47 = vsel %vm199_vm4, %v1635_v39, %v195_v41  ;;  %v204_v48 = vsel %vm199_vm4, %v193_v40, %v197_v42  ;;  %v1378_v51 = vld [vmem:[#allocation2 + $0x16c] sm:$0xf0] }
  0x8d   :  { %210 = vst [vmem:[#allocation2 + $0x128] sm:$0xf] %v201_v47  ;;  %v1304_v52 = vld [vmem:[#allocation2 + $0x180] sm:$0xf]  ;;  %v1380_v53 = vld [vmem:[#allocation2 + $0x184] sm:$0xf]  ;;  %v202_v54 = vsel %vm62_vm1, %v196_v44, %v197_v42  ;;  %v1289_v60 = vor.u32 %v1378_v51, %v1288_v58 }
  0x8e   :  { %212 = vst [vmem:[#allocation2 + $0x140] sm:$0xf] %v204_v48  ;;  %v1305_v55 = vor.u32 %v1383_v49, %v1304_v52  ;;  %v1309_v56 = vor.u32 %v1380_v53, %v1306_v50  ;;  %v203_v57 = vsel %vm199_vm4, %v191_v43, %v202_v54  ;;  %v1312_v59 = vld [vmem:[#allocation2 + $0x188] sm:$0xf] }
  0x8f   :  { %308 = vrot.lane.b32.xlu0 %v1531_v6, %s1469_s30  ;;  %310 = vrot.lane.b32.xlu1 %v1528_v5, %s1469_s30  ;;  %211 = vst [vmem:[#allocation2 + $0x138] sm:$0xff] %v203_v57  ;;  %v1313_v61 = vor.u32 %v1384_v45, %v1312_v59 }
  0x90   :  { %843 = vmatpush.bf16.msra.mxu1 %v1305_v55  ;;  %869 = vmatpush.bf16.msra.mxu3 %v1309_v56 }
  0x91   :  { %v218_v63 = vpop.permute.xlu0 %217  ;;  %v437_v0 = vpop.permute.xlu1 %436  ;;  %312 = vrot.lane.b32.xlu2 %v1534_v7, %s1469_s30 }
  0x92   :  { %v223_v3 = vrot.slane %v218_v63, 4  ;;  %v444_v8 = vrot.slane %v437_v0, 4  ;;  %v1652_v9 = vpop.permute.xlu2 %414 }
  0x93   :  { %1327 = vmatmul.msk.bf16.vlgmr.msra.gmra.mxu3 %vm819_vm5, %v1650_v62  ;;  %1326 = vmatmul.msk.bf16.vlgmr.msra.gmra.mxu1 %vm819_vm5, %v1650_v62 }
  0x94   :  { %875 = vmatpush.bf16.msrb.mxu1 %v1289_v60  ;;  %895 = vmatpush.bf16.msrb.mxu3 %v1313_v61  ;;  %v229_v10 = vsel %vm62_vm1, %v223_v3, %v224_v29  ;;  %v448_v11 = vsel %vm62_vm1, %v444_v8, %v445_v21  ;;  %v1264_v12 = vld [vmem:[#allocation2 + $0x128] sm:$0xf] }
  0x95   :  { %v230_v13 = vsel %vm226_vm2, %v218_v63, %v229_v10  ;;  %v449_v14 = vsel %vm226_vm2, %v437_v0, %v448_v11  ;;  %v1372_v15 = vld [vmem:[#allocation2 + $0x13c] sm:$0xf0]  ;;  %v420_v0 = vrot.slane %v1652_v9, 4 }
  0x96   :  { %238 = vst [vmem:[#allocation2 + $0x168] sm:$0xff] %v230_v13  ;;  %v1265_v16 = vor.u32 %v1372_v15, %v1264_v12  ;;  %v1371_v54 = vld [vmem:[#allocation2 + $0x134] sm:$0xf0] }
  0x97   :  { %458 = vst [vmem:[#allocation2 + $0x15c] sm:$0xff] %v449_v14  ;;  %50 = vrot.lane.b32.xlu0 %v1510_v1, %s1470_s6  ;;  %54 = vrot.lane.b32.xlu1 %v1512_v2, %s1470_s6 }
  0x98   :  { %876 = vmatpush.bf16.msrb.mxu1 %v1265_v16 }
  0x99   :  { %v441_v17 = vpop.permute.xlu0 %440  ;;  %v443_v18 = vpop.permute.xlu1 %442  ;;  %280 = vrot.lane.b32.xlu2 %v1525_v4, %s1470_s6 }
  0x9a   :  { %v446_v19 = vrot.slane %v441_v17, 4  ;;  %v447_v20 = vrot.slane %v443_v18, 4  ;;  %v1670_v21 = vpop.permute.xlu2 %138 }
  0x9b   :  { %v143_v22 = vrot.slane %v1670_v21, 4 }
  0x9c   :  { %v451_v23 = vsel %vm62_vm1, %v446_v19, %v447_v20  ;;  %v453_v1 = vsel %vm226_vm2, %v443_v18, %v447_v20 }
  0x9d   :  { %v452_v2 = vsel %vm226_vm2, %v441_v17, %v451_v23  ;;  %461 = vst [vmem:[#allocation2 + $0x17c] sm:$0xf] %v453_v1  ;;  %v1377_v26 = vld [vmem:[#allocation2 + $0x164] sm:$0xf0]  ;;  %v1282_v27 = vld [vmem:[#allocation2 + $0x168] sm:$0xf0]  ;;  %v150_v28 = vsel %vm145_vm6, %v1670_v21, %v143_v22 }
  0x9e   :  { %460 = vst [vmem:[#allocation2 + $0x174] sm:$0xff] %v452_v2  ;;  %v1281_v29 = vor.u32 %v1377_v26, %v1280_v24  ;;  %v1285_v30 = vor.u32 %v1374_v25, %v1282_v27  ;;  %v1375_v44 = vld [vmem:[#allocation2 + $0x15c] sm:$0xf] }
  0x9f   :  { %282 = vrot.lane.b32.xlu0 %v1531_v6, %s1470_s6  ;;  %284 = vrot.lane.b32.xlu1 %v1528_v5, %s1470_s6  ;;  %158 = vst [vmem:[#allocation2 + $0xe0] sm:$0xf] %v150_v28 }
  0xa0   :  { %823 = vmatpush.bf16.msra.mxu0 %v1281_v29  ;;  %849 = vmatpush.bf16.msra.mxu2 %v1285_v30 }
  0xa1   :  { %v1686_v33 = vpop.permute.xlu0 %165  ;;  %v187_v34 = vpop.permute.xlu1 %186  ;;  %286 = vrot.lane.b32.xlu2 %v1534_v7, %s1470_s6 }
  0xa2   :  { %v170_v35 = vrot.slane %v1686_v33, 4  ;;  %v194_v36 = vrot.slane %v187_v34, 4  ;;  %v1689_v37 = vpop.permute.xlu2 %384 }
  0xa3   :  { %1328 = vmatmul.msk.bf16.vlgmr.msrb.gmra.mxu3 %vm819_vm5, %v1650_v62 }
  0xa4   :  { %v177_v40 = vsel %vm172_vm3, %v1686_v33, %v170_v35  ;;  %v198_v42 = vsel %vm62_vm1, %v194_v36, %v195_v41  ;;  %v1240_v41 = vld [vmem:[#allocation2 + $0xf8] sm:$0xf] }
  0xa5   :  { %185 = vst [vmem:[#allocation2 + $0x110] sm:$0xf] %v177_v40  ;;  %v200_v43 = vsel %vm199_vm4, %v187_v34, %v198_v42  ;;  %v1290_v45 = vld [vmem:[#allocation2 + $0x170] sm:$0xf0] }
  0xa6   :  { %209 = vst [vmem:[#allocation2 + $0x120] sm:$0xff] %v200_v43  ;;  %v1293_v46 = vor.u32 %v1375_v44, %v1290_v45  ;;  %v1360_v25 = vld [vmem:[#allocation2 + $0xdc] sm:$0xf0] }
  0xa7   :  { %462 = vrot.lane.b32.xlu0 %v1525_v4, %s1464_s0  ;;  %464 = vrot.lane.b32.xlu1 %v1531_v6, %s1464_s0  ;;  %v1258_v6 = vld [vmem:[#allocation2 + $0x138] sm:$0xf0] }
  0xa8   :  { %901 = vmatpush.bf16.msra.mxu3 %v1293_v46 }
  0xa9   :  { %v411_v47 = vpop.permute.xlu0 %410  ;;  %v413_v48 = vpop.permute.xlu1 %412  ;;  %466 = vrot.lane.b32.xlu2 %v1528_v5, %s1464_s0 }
  0xaa   :  { %v418_v49 = vrot.slane %v411_v47, 4  ;;  %v419_v39 = vrot.slane %v413_v48, 4  ;;  %v1707_v50 = vpop.permute.xlu2 %390 }
  0xab   :  { %v395_v51 = vrot.slane %v1707_v50, 4 }
  0xac   :  { %v422_v52 = vsel %vm62_vm1, %v418_v49, %v419_v39  ;;  %v424_v4 = vsel %vm199_vm4, %v413_v48, %v419_v39  ;;  %v1366_v53 = vld [vmem:[#allocation2 + $0x10c] sm:$0xf0] }
  0xad   :  { %v423_v55 = vsel %vm199_vm4, %v411_v47, %v422_v52  ;;  %433 = vst [vmem:[#allocation2 + $0x134] sm:$0xf] %v424_v4  ;;  %v1241_v56 = vor.u32 %v1366_v53, %v1240_v41  ;;  %v1256_v57 = vld [vmem:[#allocation2 + $0x120] sm:$0xf]  ;;  %v1368_v58 = vld [vmem:[#allocation2 + $0x124] sm:$0xf]  ;;  %v401_v5 = vsel %vm172_vm3, %v1707_v50, %v395_v51 }
  0xae   :  { %432 = vst [vmem:[#allocation2 + $0x12c] sm:$0xff] %v423_v55  ;;  %v1257_v59 = vor.u32 %v1371_v54, %v1256_v57  ;;  %v1261_v60 = vor.u32 %v1368_v58, %v1258_v6 }
  0xaf   :  { %468 = vrot.lane.b32.xlu0 %v1534_v7, %s1464_s0  ;;  %877 = vmatpush.bf16.msrb.mxu1 %v1241_v56  ;;  %409 = vst [vmem:[#allocation2 + $0x11c] sm:$0xf] %v401_v5 }
  0xb0   :  { %824 = vmatpush.bf16.msra.mxu0 %v1257_v59  ;;  %850 = vmatpush.bf16.msra.mxu2 %v1261_v60 }
  0xb1   :  { %v417_v61 = vpop.permute.xlu0 %416  ;;  %v135_v63 = vpop.permute.xlu1 %134 }
  0xb2   :  { %v421_v3 = vrot.slane %v417_v61, 4  ;;  %v141_v8 = vrot.slane %v135_v63, 4  ;;  %v133_v10 = vpop.permute.xlu2 %132 }
  0xb3   :  { %v140_v11 = vrot.slane %v133_v10, 4 }
  0xb4   :  { %v425_v12 = vsel %vm62_vm1, %v420_v0, %v421_v3  ;;  %v427_v13 = vsel %vm199_vm4, %v417_v61, %v421_v3  ;;  %v147_v14 = vsel %vm145_vm6, %v135_v63, %v141_v8 }
  0xb5   :  { %v426_v7 = vsel %vm199_vm4, %v1652_v9, %v425_v12  ;;  %435 = vst [vmem:[#allocation2 + $0x14c] sm:$0xf] %v427_v13  ;;  %v144_v15 = vsel %vm62_vm1, %v140_v11, %v141_v8  ;;  %v1369_v27 = vld [vmem:[#allocation2 + $0x12c] sm:$0xf] }
  0xb6   :  { %434 = vst [vmem:[#allocation2 + $0x144] sm:$0xff] %v426_v7  ;;  %v146_v16 = vsel %vm145_vm6, %v133_v10, %v144_v15 }
  0xb7   :  { %156 = vst [vmem:[#allocation2 + $0xc8] sm:$0xf] %v147_v14 }
  0xb8   :  { %155 = vst [vmem:[#allocation2 + $0xc0] sm:$0xff] %v146_v16 }
  0xb9   :  { %v160_v17 = vpop.permute.xlu0 %159  ;;  %v164_v18 = vpop.permute.xlu1 %163 }
  0xba   :  { %v167_v19 = vrot.slane %v160_v17, 4  ;;  %v169_v20 = vrot.slane %v164_v18, 4  ;;  %v1729_v23 = vpop.permute.xlu2 %360 }
  0xbb   :  { %v367_v1 = vrot.slane %v1729_v23, 4 }
  0xbc   :  { %v171_v9 = vsel %vm62_vm1, %v167_v19, %v168_v32  ;;  %v175_v24 = vsel %vm62_vm1, %v169_v20, %v170_v35  ;;  %v392_v35 = vrot.slane %v1689_v37, 4 }
  0xbd   :  { %v173_v2 = vsel %vm172_vm3, %v160_v17, %v171_v9  ;;  %v176_v26 = vsel %vm172_vm3, %v164_v18, %v175_v24  ;;  %v1266_v28 = vld [vmem:[#allocation2 + $0x140] sm:$0xf0]  ;;  %v372_v29 = vsel %vm145_vm6, %v1729_v23, %v367_v1 }
  0xbe   :  { %182 = vst [vmem:[#allocation2 + $0xf0] sm:$0xff] %v173_v2  ;;  %v1269_v31 = vor.u32 %v1369_v27, %v1266_v28  ;;  %v1216_v30 = vld [vmem:[#allocation2 + $0xc8] sm:$0xf] }
  0xbf   :  { %184 = vst [vmem:[#allocation2 + $0x108] sm:$0xff] %v176_v26  ;;  %v1217_v32 = vor.u32 %v1360_v25, %v1216_v30  ;;  %v1208_v24 = vld [vmem:[#allocation2 + $0xc0] sm:$0xf]  ;;  %v1356_v25 = vld [vmem:[#allocation2 + $0xc4] sm:$0xf] }
  0xc0   :  { %902 = vmatpush.bf16.msra.mxu3 %v1269_v31  ;;  %381 = vst [vmem:[#allocation2 + $0xd4] sm:$0xf] %v372_v29 }
  0xc1   :  { %v387_v33 = vpop.permute.xlu0 %386  ;;  %v389_v34 = vpop.permute.xlu1 %388  ;;  %878 = vmatpush.bf16.msrb.mxu1 %v1217_v32 }
  0xc2   :  { %v393_v36 = vrot.slane %v387_v33, 4  ;;  %v394_v40 = vrot.slane %v389_v34, 4  ;;  %v1745_v42 = vpop.permute.xlu2 %80 }
  0xc3   :  { %v87_v43 = vrot.slane %v1745_v42, 4 }
  0xc4   :  { %v396_v44 = vsel %vm62_vm1, %v392_v35, %v393_v36  ;;  %v398_v45 = vsel %vm172_vm3, %v387_v33, %v393_v36  ;;  %v399_v46 = vsel %vm62_vm1, %v394_v40, %v395_v51 }
  0xc5   :  { %v397_v47 = vsel %vm172_vm3, %v1689_v37, %v396_v44  ;;  %407 = vst [vmem:[#allocation2 + $0x104] sm:$0xf] %v398_v45  ;;  %v400_v48 = vsel %vm172_vm3, %v389_v34, %v399_v46  ;;  %v1232_v49 = vld [vmem:[#allocation2 + $0xf0] sm:$0xf]  ;;  %v1362_v39 = vld [vmem:[#allocation2 + $0xf4] sm:$0xf]  ;;  %v93_v41 = vsel %vm91_vm7, %v1745_v42, %v87_v43 }
  0xc6   :  { %406 = vst [vmem:[#allocation2 + $0xfc] sm:$0xff] %v397_v47  ;;  %v1365_v52 = vld [vmem:[#allocation2 + $0x104] sm:$0xf0]  ;;  %v1234_v4 = vld [vmem:[#allocation2 + $0x108] sm:$0xf0] }
  0xc7   :  { %408 = vst [vmem:[#allocation2 + $0x114] sm:$0xff] %v400_v48  ;;  %v1233_v50 = vor.u32 %v1365_v52, %v1232_v49  ;;  %v1237_v53 = vor.u32 %v1362_v39, %v1234_v4  ;;  %v1336_v42 = vld [vmem:[#allocation2 + $0x1c] sm:$0xf0] }
  0xc8   :  { %102 = vst [vmem:[#allocation2 + $0x68] sm:$0xf] %v93_v41 }
  0xc9   :  { %825 = vmatpush.bf16.msra.mxu0 %v1233_v50  ;;  %851 = vmatpush.bf16.msra.mxu2 %v1237_v53  ;;  %v108_v37 = vpop.permute.xlu0 %107  ;;  %v112_v51 = vpop.permute.xlu1 %111 }
  0xca   :  { %v114_v54 = vrot.slane %v108_v37, 4  ;;  %v116_v6 = vrot.slane %v112_v51, 4  ;;  %v110_v55 = vpop.permute.xlu2 %109 }
  0xcb   :  { %v115_v56 = vrot.slane %v110_v55, 4 }
  0xcc   :  { %v120_v57 = vsel %vm118_vm8, %v108_v37, %v114_v54  ;;  %v123_v58 = vsel %vm118_vm8, %v112_v51, %v116_v6 }
  0xcd   :  { %129 = vst [vmem:[#allocation2 + $0x98] sm:$0xf] %v120_v57  ;;  %v1363_v5 = vld [vmem:[#allocation2 + $0xfc] sm:$0xf]  ;;  %v121_v59 = vsel %vm62_vm1, %v115_v56, %v116_v6 }
  0xce   :  { %131 = vst [vmem:[#allocation2 + $0xb0] sm:$0xf] %v123_v58  ;;  %v1242_v60 = vld [vmem:[#allocation2 + $0x110] sm:$0xf0]  ;;  %v122_v61 = vsel %vm118_vm8, %v110_v55, %v121_v59 }
  0xcf   :  { %v1245_v63 = vor.u32 %v1363_v5, %v1242_v60  ;;  %130 = vst [vmem:[#allocation2 + $0xa8] sm:$0xff] %v122_v61  ;;  %v1168_v52 = vld [vmem:[#allocation2 + $0x68] sm:$0xf] }
  0xd1   :  { %903 = vmatpush.bf16.msra.mxu3 %v1245_v63  ;;  %v137_v0 = vpop.permute.xlu0 %136  ;;  %v359_v3 = vpop.permute.xlu1 %358 }
  0xd2   :  { %v142_v8 = vrot.slane %v137_v0, 4  ;;  %v366_v10 = vrot.slane %v359_v3, 4  ;;  %v1764_v11 = vpop.permute.xlu2 %336 }
  0xd4   :  { %v148_v12 = vsel %vm62_vm1, %v142_v8, %v143_v22  ;;  %v370_v13 = vsel %vm62_vm1, %v366_v10, %v367_v1  ;;  %v1192_v14 = vld [vmem:[#allocation2 + $0x98] sm:$0xf] }
  0xd5   :  { %v149_v7 = vsel %vm145_vm6, %v137_v0, %v148_v12  ;;  %v371_v15 = vsel %vm145_vm6, %v359_v3, %v370_v13  ;;  %v1354_v16 = vld [vmem:[#allocation2 + $0xac] sm:$0xf0]  ;;  %v342_v0 = vrot.slane %v1764_v11, 4 }
  0xd6   :  { %157 = vst [vmem:[#allocation2 + $0xd8] sm:$0xff] %v149_v7  ;;  %v1193_v17 = vor.u32 %v1354_v16, %v1192_v14  ;;  %v1353_v37 = vld [vmem:[#allocation2 + $0xa4] sm:$0xf0]  ;;  %v1186_v51 = vld [vmem:[#allocation2 + $0xa8] sm:$0xf0] }
  0xd7   :  { %380 = vst [vmem:[#allocation2 + $0xcc] sm:$0xff] %v371_v15 }
  0xd8   :  { %879 = vmatpush.bf16.msrb.mxu1 %v1193_v17 }
  0xd9   :  { %v363_v18 = vpop.permute.xlu0 %362  ;;  %v365_v19 = vpop.permute.xlu1 %364 }
  0xda   :  { %v368_v20 = vrot.slane %v363_v18, 4  ;;  %v369_v21 = vrot.slane %v365_v19, 4  ;;  %v1774_v22 = vpop.permute.xlu2 %56 }
  0xdb   :  { %v61_v23 = vrot.slane %v1774_v22, 4 }
  0xdc   :  { %v373_v1 = vsel %vm62_vm1, %v368_v20, %v369_v21  ;;  %v375_v9 = vsel %vm145_vm6, %v365_v19, %v369_v21 }
  0xdd   :  { %v374_v2 = vsel %vm145_vm6, %v363_v18, %v373_v1  ;;  %383 = vst [vmem:[#allocation2 + $0xec] sm:$0xf] %v375_v9  ;;  %v1359_v26 = vld [vmem:[#allocation2 + $0xd4] sm:$0xf0]  ;;  %v1210_v27 = vld [vmem:[#allocation2 + $0xd8] sm:$0xf0]  ;;  %v69_v28 = vsel %vm64_vm9, %v1774_v22, %v61_v23 }
  0xde   :  { %382 = vst [vmem:[#allocation2 + $0xe4] sm:$0xff] %v374_v2  ;;  %v1209_v29 = vor.u32 %v1359_v26, %v1208_v24  ;;  %v1213_v31 = vor.u32 %v1356_v25, %v1210_v27  ;;  %v1357_v45 = vld [vmem:[#allocation2 + $0xcc] sm:$0xf]  ;;  %v1120_v26 = vld [vmem:[#allocation2 + $0x8] sm:$0xf] }
  0xdf   :  { %77 = vst [vmem:[#allocation2 + $0x50] sm:$0xf] %v69_v28 }
  0xe0   :  { %826 = vmatpush.bf16.msra.mxu0 %v1209_v29  ;;  %852 = vmatpush.bf16.msra.mxu2 %v1213_v31  ;;  %v544_v31 = vunpack.c.l.b16 %v1633_v38 }
  0xe1   :  { %v85_v30 = vpop.permute.xlu0 %84  ;;  %v106_v32 = vpop.permute.xlu1 %105 }
  0xe2   :  { %v89_v33 = vrot.slane %v85_v30, 4  ;;  %v113_v34 = vrot.slane %v106_v32, 4  ;;  %v1784_v35 = vpop.permute.xlu2 %306 }
  0xe4   :  { %v96_v36 = vsel %vm91_vm7, %v85_v30, %v89_v33  ;;  %v117_v40 = vsel %vm62_vm1, %v113_v34, %v114_v54  ;;  %v314_v34 = vrot.slane %v1784_v35, 4 }
  0xe5   :  { %104 = vst [vmem:[#allocation2 + $0x80] sm:$0xf] %v96_v36  ;;  %v119_v44 = vsel %vm118_vm8, %v106_v32, %v117_v40  ;;  %v1218_v46 = vld [vmem:[#allocation2 + $0xe0] sm:$0xf0] }
  0xe6   :  { %128 = vst [vmem:[#allocation2 + $0x90] sm:$0xff] %v119_v44  ;;  %v1221_v47 = vor.u32 %v1357_v45, %v1218_v46  ;;  %v1342_v1 = vld [vmem:[#allocation2 + $0x4c] sm:$0xf0] }
  0xe8   :  { %904 = vmatpush.bf16.msra.mxu3 %v1221_v47  ;;  %v1827_v47 = vpack.c.b16 %v544_v31, %v544_v31 }
  0xe9   :  { %v333_v48 = vpop.permute.xlu0 %332  ;;  %v335_v49 = vpop.permute.xlu1 %334 }
  0xea   :  { %v340_v39 = vrot.slane %v333_v48, 4  ;;  %v341_v41 = vrot.slane %v335_v49, 4 }
  0xeb   :  { %v1791_v54 = vpop.permute.xlu2 %312 }
  0xec   :  { %v344_v4 = vsel %vm62_vm1, %v340_v39, %v341_v41  ;;  %v346_v50 = vsel %vm118_vm8, %v335_v49, %v341_v41  ;;  %v1348_v53 = vld [vmem:[#allocation2 + $0x7c] sm:$0xf0]  ;;  %v317_v59 = vrot.slane %v1791_v54, 4 }
  0xed   :  { %v345_v6 = vsel %vm118_vm8, %v333_v48, %v344_v4  ;;  %355 = vst [vmem:[#allocation2 + $0xa4] sm:$0xf] %v346_v50  ;;  %v1169_v55 = vor.u32 %v1348_v53, %v1168_v52  ;;  %v1184_v56 = vld [vmem:[#allocation2 + $0x90] sm:$0xf]  ;;  %v1350_v57 = vld [vmem:[#allocation2 + $0x94] sm:$0xf] }
  0xee   :  { %354 = vst [vmem:[#allocation2 + $0x9c] sm:$0xff] %v345_v6  ;;  %v1185_v58 = vor.u32 %v1353_v37, %v1184_v56  ;;  %v1189_v5 = vor.u32 %v1350_v57, %v1186_v51  ;;  %v323_v60 = vsel %vm91_vm7, %v1791_v54, %v317_v59 }
  0xef   :  { %880 = vmatpush.bf16.msrb.mxu1 %v1169_v55  ;;  %331 = vst [vmem:[#allocation2 + $0x8c] sm:$0xf] %v323_v60 }
  0xf0   :  { %827 = vmatpush.bf16.msra.mxu0 %v1185_v58  ;;  %853 = vmatpush.bf16.msra.mxu2 %v1189_v5 }
  0xf1   :  { %v339_v61 = vpop.permute.xlu0 %338  ;;  %v1797_v63 = vpop.permute.xlu1 %52 }
  0xf2   :  { %v343_v3 = vrot.slane %v339_v61, 4  ;;  %v59_v8 = vrot.slane %v1797_v63, 4 }
  0xf3   :  { %v1807_v14 = vpop.permute.xlu2 %280 }
  0xf4   :  { %v347_v10 = vsel %vm62_vm1, %v342_v0, %v343_v3  ;;  %v349_v12 = vsel %vm118_vm8, %v339_v61, %v343_v3  ;;  %v66_v13 = vsel %vm64_vm9, %v1797_v63, %v59_v8  ;;  %v288_v61 = vrot.slane %v1807_v14, 4 }
  0xf5   :  { %v348_v7 = vsel %vm118_vm8, %v1764_v11, %v347_v10  ;;  %357 = vst [vmem:[#allocation2 + $0xbc] sm:$0xf] %v349_v12  ;;  %v1351_v21 = vld [vmem:[#allocation2 + $0x9c] sm:$0xf]  ;;  %v1335_v10 = vld [vmem:[#allocation2 + $0x14] sm:$0xf0] }
  0xf6   :  { %356 = vst [vmem:[#allocation2 + $0xb4] sm:$0xff] %v348_v7  ;;  %v1332_v12 = vld [vmem:[#allocation2 + $0x4] sm:$0xf] }
  0xf7   :  { %75 = vst [vmem:[#allocation2 + $0x38] sm:$0xf] %v66_v13  ;;  %v1114_v13 = vld [vmem:[#allocation2 + $0x18] sm:$0xf0] }
  0xf9   :  { %v79_v15 = vpop.permute.xlu0 %78  ;;  %v83_v16 = vpop.permute.xlu1 %82 }
  0xfa   :  { %v86_v17 = vrot.slane %v79_v15, 4  ;;  %v88_v18 = vrot.slane %v83_v16, 4 }
  0xfb   :  { %v1815_v9 = vpop.permute.xlu2 %286 }
  0xfc   :  { %v90_v19 = vsel %vm62_vm1, %v86_v17, %v87_v43  ;;  %v94_v20 = vsel %vm62_vm1, %v88_v18, %v89_v33  ;;  %v291_v2 = vrot.slane %v1815_v9, 4  ;;  %v1121_v33 = vor.u32 %v1336_v42, %v1120_v26 }
  0xfd   :  { %v92_v24 = vsel %vm91_vm7, %v79_v15, %v90_v19  ;;  %v95_v11 = vsel %vm91_vm7, %v83_v16, %v94_v20  ;;  %v1194_v25 = vld [vmem:[#allocation2 + $0xb0] sm:$0xf0] }
  0xfe   :  { %101 = vst [vmem:[#allocation2 + $0x60] sm:$0xff] %v92_v24  ;;  %v1197_v27 = vor.u32 %v1351_v21, %v1194_v25  ;;  %v1144_v28 = vld [vmem:[#allocation2 + $0x38] sm:$0xf]  ;;  %v297_v29 = vsel %vm64_vm9, %v1815_v9, %v291_v2 }
  0xff   :  { %103 = vst [vmem:[#allocation2 + $0x78] sm:$0xff] %v95_v11  ;;  %v1145_v43 = vor.u32 %v1342_v1, %v1144_v28  ;;  %v1117_v11 = vor.u32 %v1332_v12, %v1114_v13  ;;  %v1379_v25 = vld [vmem:[#allocation2 + $0x174] sm:$0xf0]  ;;  %v1376_v28 = vld [vmem:[#allocation2 + $0x164] sm:$0xf] }
 0x100   :  { %905 = vmatpush.bf16.msra.mxu3 %v1197_v27  ;;  %305 = vst [vmem:[#allocation2 + $0x5c] sm:$0xf] %v297_v29  ;;  %v1296_v27 = vld [vmem:[#allocation2 + $0x160] sm:$0xf] }
 0x101   :  { %v309_v30 = vpop.permute.xlu0 %308  ;;  %v311_v32 = vpop.permute.xlu1 %310  ;;  %881 = vmatpush.bf16.msrb.mxu1 %v1145_v43  ;;  %v1297_v29 = vor.u32 %v1379_v25, %v1296_v27 }
 0x102   :  { %v315_v36 = vrot.slane %v309_v30, 4  ;;  %v316_v40 = vrot.slane %v311_v32, 4 }
 0x104   :  { %v318_v44 = vsel %vm62_vm1, %v314_v34, %v315_v36  ;;  %v320_v45 = vsel %vm91_vm7, %v309_v30, %v315_v36  ;;  %v321_v46 = vsel %vm62_vm1, %v316_v40, %v317_v59  ;;  %v1373_v30 = vld [vmem:[#allocation2 + $0x144] sm:$0xf0]  ;;  %v467_v36 = vpop.permute.xlu2 %466  ;;  %v1333_v40 = vld [vmem:[#allocation2 + $0xc] sm:$0xf] }
 0x105   :  { %v319_v48 = vsel %vm91_vm7, %v1784_v35, %v318_v44  ;;  %329 = vst [vmem:[#allocation2 + $0x74] sm:$0xf] %v320_v45  ;;  %v322_v38 = vsel %vm91_vm7, %v311_v32, %v321_v46  ;;  %v1160_v49 = vld [vmem:[#allocation2 + $0x60] sm:$0xf]  ;;  %v1344_v39 = vld [vmem:[#allocation2 + $0x64] sm:$0xf]  ;;  %882 = vmatpush.bf16.msrb.mxu1 %v1121_v33 }
 0x106   :  { %328 = vst [vmem:[#allocation2 + $0x6c] sm:$0xff] %v319_v48  ;;  %v1347_v41 = vld [vmem:[#allocation2 + $0x74] sm:$0xf0]  ;;  %v1162_v52 = vld [vmem:[#allocation2 + $0x78] sm:$0xf0] }
 0x107   :  { %330 = vst [vmem:[#allocation2 + $0x84] sm:$0xff] %v322_v38  ;;  %v1161_v4 = vor.u32 %v1347_v41, %v1160_v49  ;;  %v1165_v50 = vor.u32 %v1344_v39, %v1162_v52  ;;  %v1274_v32 = vld [vmem:[#allocation2 + $0x148] sm:$0xf0]  ;;  %v1122_v45 = vld [vmem:[#allocation2 + $0x20] sm:$0xf0]  ;;  %v472_v49 = vrot.slane %v467_v36, 4 }
 0x108   :  { %883 = vmatmul.bf16.vlgmr.msrb.gmra.mxu1 %v1827_v47  ;;  %v1272_v48 = vld [vmem:[#allocation2 + $0x130] sm:$0xf]  ;;  %v1370_v38 = vld [vmem:[#allocation2 + $0x134] sm:$0xf]  ;;  %v1250_v52 = vld [vmem:[#allocation2 + $0x118] sm:$0xf0] }
 0x109   :  { %828 = vmatpush.bf16.msra.mxu0 %v1161_v4  ;;  %854 = vmatpush.bf16.msra.mxu2 %v1165_v50  ;;  %v51_v53 = vpop.permute.xlu0 %50  ;;  %v55_v37 = vpop.permute.xlu1 %54  ;;  %v1273_v39 = vor.u32 %v1373_v30, %v1272_v48  ;;  %v1277_v41 = vor.u32 %v1370_v38, %v1274_v32  ;;  %v1125_v50 = vor.u32 %v1333_v40, %v1122_v45  ;;  %v1337_v30 = vld [vmem:[#allocation2 + $0x24] sm:$0xf0]  ;;  %v1334_v32 = vld [vmem:[#allocation2 + $0x14] sm:$0xf] }
 0x10a   :  { %v58_v51 = vrot.slane %v51_v53, 4  ;;  %v60_v35 = vrot.slane %v55_v37, 4 }
 0x10c   :  { %v63_v54 = vsel %vm62_vm1, %v58_v51, %v59_v8  ;;  %v67_v6 = vsel %vm62_vm1, %v60_v35, %v61_v23  ;;  %v1112_v8 = vld [vmem:[#allocation2] sm:$0xf]  ;;  %v1364_v51 = vld [vmem:[#allocation2 + $0x104] sm:$0xf] }
 0x10d   :  { %v65_v55 = vsel %vm64_vm9, %v51_v53, %v63_v54  ;;  %v68_v56 = vsel %vm64_vm9, %v55_v37, %v67_v6  ;;  %v1345_v57 = vld [vmem:[#allocation2 + $0x6c] sm:$0xf]  ;;  %v1113_v24 = vor.u32 %v1335_v10, %v1112_v8  ;;  %v1248_v53 = vld [vmem:[#allocation2 + $0x100] sm:$0xf]  ;;  %v1367_v37 = vld [vmem:[#allocation2 + $0x114] sm:$0xf0] }
 0x10e   :  { %74 = vst [vmem:[#allocation2 + $0x30] sm:$0xff] %v65_v55  ;;  %v1170_v58 = vld [vmem:[#allocation2 + $0x80] sm:$0xf0]  ;;  %v1200_v8 = vld [vmem:[#allocation2 + $0xa0] sm:$0xf] }
 0x10f   :  { %76 = vst [vmem:[#allocation2 + $0x48] sm:$0xff] %v68_v56  ;;  %v1173_v5 = vor.u32 %v1345_v57, %v1170_v58  ;;  %v1249_v57 = vor.u32 %v1367_v37, %v1248_v53  ;;  %v1253_v58 = vor.u32 %v1364_v51, %v1250_v52  ;;  %v1352_v10 = vld [vmem:[#allocation2 + $0xa4] sm:$0xf]  ;;  %v1176_v12 = vld [vmem:[#allocation2 + $0x70] sm:$0xf] }
 0x110   :  { %v1855_v6 = vpop.f32.mrf.mxu1  ;;  %v1349_v13 = vld [vmem:[#allocation2 + $0x84] sm:$0xf0] }
 0x111   :  { %906 = vmatpush.bf16.msra.mxu3 %v1173_v5  ;;  %v283_v59 = vpop.permute.xlu0 %282  ;;  %v285_v60 = vpop.permute.xlu1 %284 }
 0x112   :  { %v289_v63 = vrot.slane %v283_v59, 4  ;;  %v290_v0 = vrot.slane %v285_v60, 4 }
 0x114   :  { %v292_v22 = vsel %vm62_vm1, %v288_v61, %v289_v63  ;;  %v294_v23 = vsel %vm64_vm9, %v283_v59, %v289_v63  ;;  %v295_v3 = vsel %vm62_vm1, %v290_v0, %v291_v2  ;;  %v1298_v2 = vld [vmem:[#allocation2 + $0x178] sm:$0xf0]  ;;  %v1361_v59 = vld [vmem:[#allocation2 + $0xe4] sm:$0xf0]  ;;  %v1224_v61 = vld [vmem:[#allocation2 + $0xd0] sm:$0xf] }
 0x115   :  { %v293_v7 = vsel %vm64_vm9, %v1807_v14, %v292_v22  ;;  %303 = vst [vmem:[#allocation2 + $0x44] sm:$0xf] %v294_v23  ;;  %v296_v15 = vsel %vm64_vm9, %v285_v60, %v295_v3  ;;  %v1136_v16 = vld [vmem:[#allocation2 + $0x30] sm:$0xf]  ;;  %v1338_v17 = vld [vmem:[#allocation2 + $0x34] sm:$0xf]  ;;  %v1301_v31 = vor.u32 %v1376_v28, %v1298_v2  ;;  %v1225_v0 = vor.u32 %v1361_v59, %v1224_v61 }
 0x116   :  { %302 = vst [vmem:[#allocation2 + $0x3c] sm:$0xff] %v293_v7  ;;  %v1341_v18 = vld [vmem:[#allocation2 + $0x44] sm:$0xf0]  ;;  %v1138_v19 = vld [vmem:[#allocation2 + $0x48] sm:$0xf0]  ;;  %v1853_v54 = vpop.f32.mrf.mxu3 }
 0x117   :  { %304 = vst [vmem:[#allocation2 + $0x54] sm:$0xff] %v296_v15  ;;  %v1137_v20 = vor.u32 %v1341_v18, %v1136_v16  ;;  %v1141_v21 = vor.u32 %v1338_v17, %v1138_v19  ;;  %v1226_v60 = vld [vmem:[#allocation2 + $0xe8] sm:$0xf0]  ;;  %v1358_v63 = vld [vmem:[#allocation2 + $0xd4] sm:$0xf] }
 0x118   :  { %v1229_v22 = vor.u32 %v1358_v63, %v1226_v60  ;;  %v1355_v23 = vld [vmem:[#allocation2 + $0xb4] sm:$0xf0]  ;;  %v1202_v3 = vld [vmem:[#allocation2 + $0xb8] sm:$0xf0]  ;;  %v1346_v7 = vld [vmem:[#allocation2 + $0x74] sm:$0xf]  ;;  %v847_v17 = vpop.f32.mrf.mxu1 }
 0x119   :  { %829 = vmatpush.bf16.msra.mxu0 %v1137_v20  ;;  %855 = vmatpush.bf16.msra.mxu2 %v1141_v21  ;;  %v463_v1 = vpop.permute.xlu0 %462  ;;  %v465_v9 = vpop.permute.xlu1 %464  ;;  %v1178_v15 = vld [vmem:[#allocation2 + $0x88] sm:$0xf0]  ;;  %v1201_v18 = vor.u32 %v1355_v23, %v1200_v8  ;;  %v1205_v19 = vor.u32 %v1352_v10, %v1202_v3  ;;  %v1154_v28 = vld [vmem:[#allocation2 + $0x58] sm:$0xf0] }
 0x11a   :  { %v470_v14 = vrot.slane %v463_v1, 4  ;;  %v471_v26 = vrot.slane %v465_v9, 4  ;;  %v1181_v27 = vor.u32 %v1346_v7, %v1178_v15 }
 0x11c   :  { %v474_v42 = vsel %vm62_vm1, %v470_v14, %v471_v26  ;;  %v476_v43 = vsel %vm253_vm0, %v465_v9, %v471_v26  ;;  %v1177_v26 = vor.u32 %v1349_v13, %v1176_v12 }
 0x11d   :  { %v475_v33 = vsel %vm253_vm0, %v463_v1, %v474_v42  ;;  %485 = vst [vmem:[#allocation2 + $0x194] sm:$0xf] %v476_v43  ;;  %830 = vmatpush.bf16.msra.mxu0 %v1113_v24  ;;  %856 = vmatpush.bf16.msra.mxu2 %v1117_v11  ;;  %v1339_v34 = vld [vmem:[#allocation2 + $0x3c] sm:$0xf]  ;;  %v1152_v42 = vld [vmem:[#allocation2 + $0x40] sm:$0xf] }
 0x11e   :  { %484 = vst [vmem:[#allocation2 + $0x18c] sm:$0xff] %v475_v33  ;;  %v1146_v44 = vld [vmem:[#allocation2 + $0x50] sm:$0xf0]  ;;  %v873_v16 = vpop.f32.mrf.mxu3  ;;  %v1343_v43 = vld [vmem:[#allocation2 + $0x54] sm:$0xf0] }
 0x11f   :  { %v1149_v46 = vor.u32 %v1339_v34, %v1146_v44  ;;  %v1130_v33 = vld [vmem:[#allocation2 + $0x28] sm:$0xf0] }
 0x120   :  { %857 = vmatmul.bf16.vlgmr.msra.gmra.mxu2 %v1827_v47  ;;  %831 = vmatmul.bf16.vlgmr.msra.gmra.mxu0 %v1827_v47  ;;  %v1133_v45 = vor.u32 %v1334_v32, %v1130_v33 }
 0x121   :  { %927 = vmatpush.bf16.msrb.mxu2 %v1297_v29  ;;  %953 = vmatpush.bf16.msrb.mxu0 %v1301_v31  ;;  %v469_v4 = vpop.permute.xlu0 %468  ;;  %v1340_v29 = vld [vmem:[#allocation2 + $0x44] sm:$0xf]  ;;  %v1128_v31 = vld [vmem:[#allocation2 + $0x10] sm:$0xf] }
 0x122   :  { %907 = vmatpush.bf16.msra.mxu3 %v1149_v46  ;;  %v473_v35 = vrot.slane %v469_v4, 4  ;;  %v1157_v40 = vor.u32 %v1340_v29, %v1154_v28  ;;  %v1129_v44 = vor.u32 %v1337_v30, %v1128_v31 }
 0x124   :  { %v479_v55 = vsel %vm253_vm0, %v469_v4, %v473_v35  ;;  %v477_v56 = vsel %vm62_vm1, %v472_v49, %v473_v35  ;;  %v1382_v21 = vld [vmem:[#allocation2 + $0x194] sm:$0xf] }
 0x125   :  { %928 = vmatpush.bf16.msrb.mxu2 %v1273_v39  ;;  %954 = vmatpush.bf16.msrb.mxu0 %v1277_v41  ;;  %487 = vst [vmem:[#allocation2 + $0x1ac] sm:$0xf] %v479_v55  ;;  %v478_v5 = vsel %vm253_vm0, %v467_v36, %v477_v56  ;;  %v1381_v20 = vld [vmem:[#allocation2 + $0x18c] sm:$0xf]  ;;  %v1320_v24 = vld [vmem:[#allocation2 + $0x190] sm:$0xf]  ;;  %v1153_v36 = vor.u32 %v1343_v43, %v1152_v42 }
 0x126   :  { %908 = vmatpush.bf16.msra.mxu3 %v1125_v50  ;;  %486 = vst [vmem:[#allocation2 + $0x1a4] sm:$0xff] %v478_v5  ;;  %v897_v34 = vpop.f32.mrf.mxu3  ;;  %v979_v39 = vld [vmem:[%s1900_s2] sm:$0x7] }
 0x127   :  { %v983_v52 = vperm.slane %v979_v39, 0  ;;  %v984_v4 = vperm.slane %v979_v39, 1  ;;  %v985_v37 = vperm.slane %v979_v39, 2 }
 0x129   :  { %929 = vmatpush.bf16.msrb.mxu2 %v1249_v57  ;;  %955 = vmatpush.bf16.msrb.mxu0 %v1253_v58 }
 0x12a   :  { %909 = vmatmul.bf16.vlgmr.msra.gmra.mxu3 %v1827_v47 }
 0x12c   :  { %v1322_v1 = vld [vmem:[#allocation2 + $0x1a8] sm:$0xf0] }
 0x12d   :  { %930 = vmatpush.bf16.msrb.mxu2 %v1225_v0  ;;  %956 = vmatpush.bf16.msrb.mxu0 %v1229_v22  ;;  %v1314_v9 = vld [vmem:[#allocation2 + $0x1a0] sm:$0xf0]  ;;  %v1385_v11 = vld [vmem:[#allocation2 + $0x1a4] sm:$0xf0]  ;;  %v1325_v14 = vor.u32 %v1382_v21, %v1322_v1 }
 0x12e   :  { %v1317_v25 = vor.u32 %v1381_v20, %v1314_v9  ;;  %v1321_v2 = vor.u32 %v1385_v11, %v1320_v24  ;;  %v899_v46 = vpop.f32.mrf.mxu3 }
 0x130   :  { %921 = vmatpush.bf16.msrb.mxu3 %v1317_v25  ;;  %947 = vmatpush.bf16.msra.mxu1 %v1321_v2 }
 0x131   :  { %931 = vmatpush.bf16.msrb.mxu2 %v1201_v18  ;;  %957 = vmatpush.bf16.msrb.mxu0 %v1205_v19 }
 0x133   :  { %1330 = vmatmul.msk.bf16.vlgmr.msra.gmra.mxu1 %vm819_vm5, %v1650_v62 }
 0x134   :  { %973 = vmatpush.bf16.msrb.mxu1 %v1325_v14 }
 0x135   :  { %932 = vmatpush.bf16.msrb.mxu2 %v1177_v26  ;;  %958 = vmatpush.bf16.msrb.mxu0 %v1181_v27 }
 0x139   :  { %933 = vmatpush.bf16.msrb.mxu2 %v1153_v36  ;;  %959 = vmatpush.bf16.msrb.mxu0 %v1157_v40 }
 0x13a   :  { %1329 = vmatmul.msk.bf16.vlgmr.msrb.gmra.mxu3 %vm819_vm5, %v1650_v62 }
 0x13d   :  { %934 = vmatpush.bf16.msrb.mxu2 %v1129_v44  ;;  %960 = vmatpush.bf16.msrb.mxu0 %v1133_v45 }
 0x140   :  { %935 = vmatmul.bf16.vlgmr.msrb.gmra.mxu2 %v1827_v47  ;;  %961 = vmatmul.bf16.vlgmr.msrb.gmra.mxu0 %v1827_v47 }
 0x143   :  { %1331 = vmatmul.msk.bf16.vlgmr.msrb.gmra.mxu1 %vm819_vm5, %v1650_v62 }
 0x185   :  { %v884_v48 = vpop.f32.mrf.mxu1 }
 0x186   :  { %v898_v53 = vadd.f32 %v897_v34, %v884_v48  ;;  %v1471_v48 = vmov 0  }
 0x187   :  { %1401 = vset.pattern.permute.xlu1 %v1471_v48  ;;  %1403 = vset.pattern.permute.xlu0 %v1471_v48 }
 0x188   :  { %v991_v62 = vmul.f32 %v985_v37, %v898_v53  ;;  %1402 = vset.pattern.permute.xlu2 %v1471_v48 }
 0x18d   :  { %v886_v38 = vpop.f32.mrf.mxu1 }
 0x18e   :  { %v981_v38 = vld [vmem:[%s1902_s4] sm:$0xff] }
 0x19d   :  { %v832_v49 = vpop.f32.mrf.mxu0 }
 0x19e   :  { %v846_v41 = vadd.f32 %v1855_v6, %v832_v49 }
 0x1a0   :  { %v989_v35 = vmul.f32 %v983_v52, %v846_v41 }
 0x1a3   :  { %v858_v50 = vpop.f32.mrf.mxu2 }
 0x1a4   :  { %v872_v51 = vadd.f32 %v1853_v54, %v858_v50 }
 0x1a5   :  { %v834_v47 = vpop.f32.mrf.mxu0 }
 0x1a6   :  { %v990_v55 = vmul.f32 %v984_v4, %v872_v51 }
 0x1a8   :  { %v992_v56 = vadd.f32 %v990_v55, %v989_v35 }
 0x1aa   :  { %v993_v57 = vadd.f32 %v992_v56, %v991_v62 }
 0x1ab   :  { %v860_v5 = vpop.f32.mrf.mxu2 }
 0x1ac   :  { %994 = vadd.xlane.f32.xlu1 %v993_v57 }
 0x1ad   :  { %v910_v58 = vpop.f32.mrf.mxu3 }
 0x1b0   :  { %v949_v59 = vpop.f32.mrf.mxu1 }
 0x1b5   :  { %v912_v60 = vpop.f32.mrf.mxu3 }
 0x1b8   :  { %v951_v61 = vpop.f32.mrf.mxu1 }
 0x1bd   :  { %v962_v6 = vpop.f32.mrf.mxu0  ;;  %v923_v63 = vpop.f32.mrf.mxu3 }
 0x1be   :  { %v924_v0 = vadd.f32 %v923_v63, %v910_v58 }
 0x1c0   :  { %v975_v23 = vpop.f32.mrf.mxu1  ;;  %v1042_v10 = vmul.f32 %v983_v52, %v924_v0 }
 0x1c1   :  { %v976_v8 = vadd.f32 %v975_v23, %v962_v6 }
 0x1c3   :  { %v936_v22 = vpop.f32.mrf.mxu2  ;;  %v1044_v13 = vmul.f32 %v985_v37, %v976_v8 }
 0x1c4   :  { %v950_v3 = vadd.f32 %v949_v59, %v936_v22 }
 0x1c5   :  { %v964_v54 = vpop.f32.mrf.mxu0  ;;  %v925_v7 = vpop.f32.mrf.mxu3 }
 0x1c6   :  { %v1043_v12 = vmul.f32 %v984_v4, %v950_v3 }
 0x1c8   :  { %v1045_v15 = vadd.f32 %v1043_v12, %v1042_v10  ;;  %v977_v18 = vpop.f32.mrf.mxu1 }
 0x1ca   :  { %v1046_v16 = vadd.f32 %v1045_v15, %v1044_v13 }
 0x1cb   :  { %v938_v17 = vpop.f32.mrf.mxu2 }
 0x1cc   :  { %1047 = vadd.xlane.f32.xlu2 %v1046_v16 }
 0x21f   :  { %v995_v19 = vpop.xlane.xlu1 %994 }
 0x220   :  { %v996_v20 = vmul.f32 0.00390625, %v995_v19 }
 0x222   :  { %v1874_v21 = vsub.f32 %v846_v41, %v996_v20  ;;  %v1876_v1 = vsub.f32 %v872_v51, %v996_v20  ;;  %v1878_v9 = vsub.f32 %v898_v53, %v996_v20  ;;  %v980_v51 = vld [vmem:[%s1901_s3] sm:$0xff]  ;;  %s1472_s3 = smov [#allocation6]  }
 0x223   :  { %s1095_s4 = sshll.u32 %s1472_s3, 4  ;;  %s1096_s4 = int_to_ptr.vmem [resolvable:$true] %s1095_s4 }
 0x224   :  { %v1000_v24 = vmul.f32 %v1874_v21, %v1874_v21  ;;  %v1001_v11 = vmul.f32 %v1876_v1, %v1876_v1  ;;  %v1002_v25 = vmul.f32 %v1878_v9, %v1878_v9 }
 0x226   :  { %v1003_v2 = vmul.f32 %v1000_v24, %v983_v52  ;;  %v1004_v14 = vmul.f32 %v1001_v11, %v984_v4  ;;  %v1005_v26 = vmul.f32 %v1002_v25, %v985_v37 }
 0x228   :  { %v1006_v27 = vadd.f32 %v1004_v14, %v1003_v2 }
 0x22a   :  { %v1007_v28 = vadd.f32 %v1006_v27, %v1005_v26 }
 0x22c   :  { %1008 = vadd.xlane.f32.xlu0 %v1007_v28 }
 0x23f   :  { %v1048_v42 = vpop.xlane.xlu2 %1047 }
 0x240   :  { %v1049_v43 = vmul.f32 0.00390625, %v1048_v42  ;;  %1033 = vperm.xlu0 %1403, %v981_v38  }
 0x242   :  { %v1050_v29 = vsub.f32 %v924_v0, %v1049_v43  ;;  %v1051_v31 = vsub.f32 %v950_v3, %v1049_v43  ;;  %v1052_v30 = vsub.f32 %v976_v8, %v1049_v43 }
 0x244   :  { %v1053_v32 = vmul.f32 %v1050_v29, %v1050_v29  ;;  %v1054_v33 = vmul.f32 %v1051_v31, %v1051_v31  ;;  %v1055_v34 = vmul.f32 %v1052_v30, %v1052_v30 }
 0x246   :  { %v1056_v36 = vmul.f32 %v1053_v32, %v983_v52  ;;  %v1057_v40 = vmul.f32 %v1054_v33, %v984_v4  ;;  %v1058_v44 = vmul.f32 %v1055_v34, %v985_v37 }
 0x248   :  { %v1059_v45 = vadd.f32 %v1057_v40, %v1056_v36 }
 0x24a   :  { %v1060_v46 = vadd.f32 %v1059_v45, %v1058_v44 }
 0x24c   :  { %1061 = vadd.xlane.f32.xlu2 %v1060_v46 }
 0x29f   :  { %v1009_v49 = vpop.xlane.xlu0 %1008 }
 0x2a0   :  { %v1010_v39 = vmul.f32 0.00390625, %v1009_v49 }
 0x2a2   :  { %v1011_v41 = vadd.f32 1e-05, %v1010_v39 }
 0x2a4   :  { %1404 = vrsqrt.f32 %v1011_v41  ;;  %vm1018_vm11 = vweird.f32 %v1011_v41 }
 0x2aa   :  { %v1405_v50 = vpop.eup %1404 }
 0x2ab   :  { %v1013_v52 = vmul.f32 %v1405_v50, %v1011_v41  ;;  %vm1019_vm10 = vweird.f32 %v1405_v50 }
 0x2ac   :  { %vm1020_vm12 = vmor %vm1018_vm11, %vm1019_vm10 }
 0x2ad   :  { %v1014_v4 = vmul.f32 %v1405_v50, %v1013_v52 }
 0x2af   :  { %v1015_v53 = vmul.f32 0.5, %v1014_v4 }
 0x2b1   :  { %v1016_v37 = vsub.f32 1.5, %v1015_v53 }
 0x2b2   :  { %v1034_v23 = vpop.permute.xlu0 %1033 }
 0x2b3   :  { %v1017_v47 = vmul.f32 %v1405_v50, %v1016_v37 }
 0x2b5   :  { %v1021_v35 = vsel %vm1020_vm12, %v1405_v50, %v1017_v47 }
 0x2b6   :  { %v1022_v55 = vmul.f32 %v1021_v35, %v980_v51 }
 0x2b8   :  { %1025 = vperm.xlu1 %1401, %v1022_v55  }
 0x2bf   :  { %v1062_v62 = vpop.xlane.xlu2 %1061 }
 0x2c0   :  { %v1063_v56 = vmul.f32 0.00390625, %v1062_v62 }
 0x2c2   :  { %v1064_v57 = vadd.f32 1e-05, %v1063_v56 }
 0x2c4   :  { %1406 = vrsqrt.f32 %v1064_v57  ;;  %vm1071_vm14 = vweird.f32 %v1064_v57 }
 0x2ca   :  { %v1407_v58 = vpop.eup %1406 }
 0x2cb   :  { %v1066_v5 = vmul.f32 %v1407_v58, %v1064_v57  ;;  %vm1072_vm13 = vweird.f32 %v1407_v58 }
 0x2cc   :  { %vm1073_vm15 = vmor %vm1071_vm14, %vm1072_vm13 }
 0x2cd   :  { %v1067_v59 = vmul.f32 %v1407_v58, %v1066_v5 }
 0x2cf   :  { %v1068_v60 = vmul.f32 0.5, %v1067_v59 }
 0x2d1   :  { %v1069_v61 = vsub.f32 1.5, %v1068_v60 }
 0x2d3   :  { %v1070_v6 = vmul.f32 %v1407_v58, %v1069_v61 }
 0x2d5   :  { %v1074_v63 = vsel %vm1073_vm15, %v1407_v58, %v1070_v6 }
 0x2d6   :  { %v1075_v0 = vmul.f32 %v1074_v63, %v980_v51 }
 0x2d8   :  { %1078 = vperm.xlu2 %1402, %v1075_v0  }
 0x32a   :  { %v1026_v22 = vpop.permute.xlu1 %1025 }
 0x32b   :  { %v1028_v3 = vmul.f32 %v1026_v22, %v1874_v21  ;;  %v1029_v8 = vmul.f32 %v1026_v22, %v1876_v1  ;;  %v1030_v54 = vmul.f32 %v1026_v22, %v1878_v9 }
 0x32d   :  { %v1036_v10 = vadd.f32 %v1034_v23, %v1028_v3  ;;  %v1037_v12 = vadd.f32 %v1034_v23, %v1029_v8  ;;  %v1038_v13 = vadd.f32 %v1034_v23, %v1030_v54 }
 0x32f   :  { %1039 = vst [vmem:[#allocation6] sm:$0xff] %v1036_v10 }
 0x330   :  { %1040 = vst [vmem:[#allocation6 + $0x8] sm:$0xff] %v1037_v12 }
 0x331   :  { %1041 = vst [vmem:[#allocation6 + $0x10] sm:$0xff] %v1038_v13 }
 0x332   :  { %v1079_v7 = vpop.permute.xlu2 %1078 }
 0x333   :  { %v1081_v15 = vmul.f32 %v1079_v7, %v1050_v29  ;;  %v1082_v16 = vmul.f32 %v1079_v7, %v1051_v31  ;;  %v1083_v17 = vmul.f32 %v1079_v7, %v1052_v30 }
 0x335   :  { %v1084_v18 = vadd.f32 %v1081_v15, %v1034_v23  ;;  %v1085_v19 = vadd.f32 %v1082_v16, %v1034_v23  ;;  %v1086_v20 = vadd.f32 %v1083_v17, %v1034_v23 }
 0x337   :  { %1088 = vst [vmem:[#allocation6 + $0x18] sm:$0xff] %v1084_v18 }
 0x338   :  { %1089 = vst [vmem:[#allocation6 + $0x20] sm:$0xff] %v1085_v19 }
 0x339   :  { %1090 = vst [vmem:[#allocation6 + $0x28] sm:$0xff] %v1086_v20 }
 0x33a   :  { %1103 = dma.vmem_to_hbm [thread:$0]  %s1096_s4, 768, %s1098_s15, [#allocation5], %s1473_s16, %s1473_s16, %s1474_s17  }
 0x33b   :  { %1458 = dma.done.wait [#allocation5], 768  }
 0x33c   :  { %1459 = vsyncadd [#allocation5], 4294966528 }
 0x33d   :  { %1108 = vsyncpa [#allocation4], 1 }
 0x33e   :  { %1109 = vsyncpa [#allocation5], 1 }

</bundles_post_ra>
